<compile_context>
chip_gen: v5e
topology: v5e:2x2
jax: 0.10.0
libtpu: 0.0.40
codegen_flags: <defaults>
</compile_context>

<pallas_src>
import functools
import math

import jax
import jax.numpy as jnp
from jax.experimental import pallas as pl
from jax.experimental.pallas import tpu as pltpu

N_IN, N_HID, N_OUT = 2, 9, 1
LANES = 128                 # TPU lane width
BLOCK_ROWS_F32 = 1024       # sublane-rows per grid step (f32 compute path)
BLOCK_ROWS_BF16 = 2048      # sublane-rows per grid step (bf16 compute path)
MIN_PALLAS_BATCH = 2048     # below this, plain XLA is faster than kernel launch


def _round_up(a, b):
    return -(-a // b) * b


def _select_compute_dtype():
    """bf16 VPU exists on v6e/v7x (2x elementwise throughput); older chips stay f32."""
    try:
        kind = jax.devices()[0].device_kind.lower()
    except Exception:
        return jnp.float32
    if "v6" in kind or "v7" in kind:
        return jnp.bfloat16
    return jnp.float32


def _make_mlp_kernel(compute_dtype):
    cdt = compute_dtype

    def kernel(x_ref, w1_ref, b1_ref, w2_ref, b2_ref, w3_ref, b3_ref, o_ref):
        """x_ref: (2, R, 128) f32 VMEM; params: flat f32 SMEM; o_ref: (R, 128) f32."""
        # Cast the batch tile once; all layer-1/2 arithmetic runs in `cdt`.
        x0 = x_ref[0].astype(cdt)
        x1 = x_ref[1].astype(cdt)

        def cvec(s):
            # Splat the f32 SMEM scalar to a (1, LANES) plane, then convert to the
            # compute dtype (avoids sub-32-bit scalar ops; the (1,128) operand
            # sublane-broadcasts inside the consuming VPU op). Each is used once.
            return jnp.full((1, LANES), s, jnp.float32).astype(cdt)

        w1 = [cvec(w1_ref[i]) for i in range(N_HID * N_IN)]
        b1 = [cvec(b1_ref[j]) for j in range(N_HID)]
        w2 = [cvec(w2_ref[i]) for i in range(N_HID * N_HID)]
        b2 = [cvec(b2_ref[j]) for j in range(N_HID)]

        # Layer 1: 2 -> 9, ReLU (per-output-unit broadcast FMA on the VPU).
        h1 = []
        for j in range(N_HID):
            h = w1[j * N_IN] * x0 + w1[j * N_IN + 1] * x1 + b1[j]
            h1.append(jnp.maximum(h, 0.0))

        # Layers 2+3 fused: h2 planes are never materialized; the logit is
        # accumulated directly in f32 -> fewer live full-tile temporaries.
        logit = None
        for j in range(N_HID):
            acc = h1[0] * w2[j * N_HID]
            for k in range(1, N_HID):
                acc = acc + h1[k] * w2[j * N_HID + k]
            h2j = jnp.maximum(acc + b2[j], 0.0)
            term = h2j.astype(jnp.float32) * w3_ref[j]     # f32 scalar from SMEM
            logit = term if logit is None else logit + term

        z = logit + b3_ref[0]
        # Sigmoid via the EUP slot: sigmoid(z) = 0.5*tanh(z/2) + 0.5.
        o_ref[...] = (0.5 * jnp.tanh(0.5 * z) + 0.5).astype(o_ref.dtype)

    return kernel


def _dense_forward(x, params):
    """Plain-XLA reference path (also used as the tiny-batch fallback)."""
    w1, b1, w2, b2, w3, b3 = params
    x = x.astype(jnp.float32)
    h1 = jax.nn.relu(x @ w1.T + b1)
    h2 = jax.nn.relu(h1 @ w2.T + b2)
    return jax.nn.sigmoid(h2 @ w3.T + b3)


def discriminator_forward(x, params, *, block_rows=None, compute_dtype=None,
                          min_pallas_batch=MIN_PALLAS_BATCH):
    """x: [B, 2] (any float dtype) -> [B, 1] float32."""
    w1, b1, w2, b2, w3, b3 = params
    B = x.shape[0]

    # Tiny batches: pallas launch + relayout overhead dominates -> XLA fallback.
    if B < min_pallas_batch:
        return _dense_forward(x, params)

    if compute_dtype is None:
        compute_dtype = _select_compute_dtype()
    if block_rows is None:
        block_rows = (BLOCK_ROWS_BF16 if compute_dtype == jnp.bfloat16
                      else BLOCK_ROWS_F32)

    # Feature-major, lane+sublane-dense layout: [B, 2] -> [2, rows_pad, 128].
    # TODO(synk): produce/store the discriminator input feature-major upstream so
    # this relayout copy (an extra un-hidden HBM pass) disappears entirely.
    rows = pl.cdiv(B, LANES)
    # >=2 grid steps whenever there is enough work (both v7x TensorCores busy),
    # tiles sized ~evenly, multiple of 8, capped at block_rows.
    n_steps = max(2, pl.cdiv(rows, block_rows)) if rows > 8 else 1
    tbs = min(block_rows, max(8, _round_up(pl.cdiv(rows, n_steps), 8)))
    rows_pad = _round_up(rows, tbs)
    b_pad = rows_pad * LANES

    xt = jnp.transpose(x.astype(jnp.float32))       # [2, B] (matches torch .float())
    xt = jnp.pad(xt, ((0, 0), (0, b_pad - B)))
    xt = xt.reshape(N_IN, rows_pad, LANES)

    smem = pl.BlockSpec(memory_space=pltpu.MemorySpace.SMEM)
    out = pl.pallas_call(
        _make_mlp_kernel(compute_dtype),
        out_shape=jax.ShapeDtypeStruct((rows_pad, LANES), jnp.float32),
        grid=(rows_pad // tbs,),
        in_specs=[
            pl.BlockSpec((N_IN, tbs, LANES), lambda i: (0, i, 0)),
            smem, smem, smem, smem, smem, smem,
        ],
        out_specs=pl.BlockSpec((tbs, LANES), lambda i: (i, 0)),
        compiler_params=pltpu.CompilerParams(
            dimension_semantics=("parallel",)),      # megacore sharding on v7x
    )(
        xt,
        w1.reshape(-1), b1.reshape(-1),
        w2.reshape(-1), b2.reshape(-1),
        w3.reshape(-1), b3.reshape(-1),
    )
    return out.reshape(b_pad)[:B].reshape(B, 1)


def _xavier_normal(key, fan_out, fan_in):
    # torch.nn.init.xavier_normal_: std = sqrt(2 / (fan_in + fan_out)).
    std = math.sqrt(2.0 / (fan_in + fan_out))
    return jax.random.normal(key, (fan_out, fan_in), dtype=jnp.float32) * std


def init_discriminator_params(key):
    k1, k2, k3 = jax.random.split(key, 3)
    return (
        _xavier_normal(k1, N_HID, N_IN), jnp.zeros((N_HID,), jnp.float32),
        _xavier_normal(k2, N_HID, N_HID), jnp.zeros((N_HID,), jnp.float32),
        _xavier_normal(k3, N_OUT, N_HID), jnp.zeros((N_OUT,), jnp.float32),
    )


if __name__ == "__main__":
    key = jax.random.PRNGKey(0)
    pkey, xkey1, xkey2 = jax.random.split(key, 3)
    params = init_discriminator_params(pkey)

    cdt = _select_compute_dtype()
    tol = 5e-2 if cdt == jnp.bfloat16 else 1e-4     # bf16 layers 1-2 on v6e/v7x

    # Force the Pallas path in this test (min_pallas_batch=0); jit so the
    # wrapper relayout fuses into a single XLA copy next to the kernel.
    fwd = jax.jit(functools.partial(discriminator_forward, min_pallas_batch=0))

    ok = True
    for b, xk in ((8, xkey1), (1536, xkey2)):       # 1536 exercises a 2-step grid + padding
        x = jax.random.normal(xk, (b, N_IN), dtype=jnp.float32)
        out = jax.block_until_ready(fwd(x, params))
        ref = _dense_forward(x, params)
        ok &= out.shape == (b, 1)
        ok &= bool(jnp.all((out >= 0.0) & (out <= 1.0)))
        ok &= bool(jnp.allclose(out, ref, atol=tol, rtol=tol))
    assert ok

    print("KERNEL_OK")
</pallas_src>

<mosaic_0001>
module attributes {stable_mosaic.version = 11 : i64} {
  func.func @kernel(%arg0: i32, %arg1: memref<2x8x128xf32, #tpu.memory_space<vmem>>, %arg2: memref<18xf32, #tpu.memory_space<smem>>, %arg3: memref<9xf32, #tpu.memory_space<smem>>, %arg4: memref<81xf32, #tpu.memory_space<smem>>, %arg5: memref<9xf32, #tpu.memory_space<smem>>, %arg6: memref<9xf32, #tpu.memory_space<smem>>, %arg7: memref<1xf32, #tpu.memory_space<smem>>, %arg8: memref<8x128xf32, #tpu.memory_space<vmem>>) attributes {dimension_semantics = [#tpu.dimension_semantics<parallel>], iteration_bounds = array<i64: 1>, scalar_prefetch = 0 : i64, scratch_operands = 0 : i64, tpu.core_type = #tpu.core_type<tc>, window_params = [{transform_indices = @transform_0, window_bounds = array<i64: 2, 8, 128>}, {transform_indices = @transform_1, window_bounds = array<i64: 18>}, {transform_indices = @transform_2, window_bounds = array<i64: 9>}, {transform_indices = @transform_3, window_bounds = array<i64: 81>}, {transform_indices = @transform_4, window_bounds = array<i64: 9>}, {transform_indices = @transform_5, window_bounds = array<i64: 9>}, {transform_indices = @transform_6, window_bounds = array<i64: 1>}, {transform_indices = @transform_7, window_bounds = array<i64: 8, 128>}]} {
    %c0 = arith.constant 0 : index
    %c0_0 = arith.constant 0 : index
    %c0_1 = arith.constant 0 : index
    %0 = vector.load %arg1[%c0, %c0_0, %c0_1] : memref<2x8x128xf32, #tpu.memory_space<vmem>>, vector<1x8x128xf32>
    %1 = vector.shape_cast %0 : vector<1x8x128xf32> to vector<8x128xf32>
    %c1 = arith.constant 1 : index
    %c0_2 = arith.constant 0 : index
    %c0_3 = arith.constant 0 : index
    %2 = vector.load %arg1[%c1, %c0_2, %c0_3] : memref<2x8x128xf32, #tpu.memory_space<vmem>>, vector<1x8x128xf32>
    %3 = vector.shape_cast %2 : vector<1x8x128xf32> to vector<8x128xf32>
    %c0_4 = arith.constant 0 : index
    %4 = memref.load %arg2[%c0_4] : memref<18xf32, #tpu.memory_space<smem>>
    %5 = vector.broadcast %4 : f32 to vector<1x128xf32>
    %c1_5 = arith.constant 1 : index
    %6 = memref.load %arg2[%c1_5] : memref<18xf32, #tpu.memory_space<smem>>
    %7 = vector.broadcast %6 : f32 to vector<1x128xf32>
    %c2 = arith.constant 2 : index
    %8 = memref.load %arg2[%c2] : memref<18xf32, #tpu.memory_space<smem>>
    %9 = vector.broadcast %8 : f32 to vector<1x128xf32>
    %c3 = arith.constant 3 : index
    %10 = memref.load %arg2[%c3] : memref<18xf32, #tpu.memory_space<smem>>
    %11 = vector.broadcast %10 : f32 to vector<1x128xf32>
    %c4 = arith.constant 4 : index
    %12 = memref.load %arg2[%c4] : memref<18xf32, #tpu.memory_space<smem>>
    %13 = vector.broadcast %12 : f32 to vector<1x128xf32>
    %c5 = arith.constant 5 : index
    %14 = memref.load %arg2[%c5] : memref<18xf32, #tpu.memory_space<smem>>
    %15 = vector.broadcast %14 : f32 to vector<1x128xf32>
    %c6 = arith.constant 6 : index
    %16 = memref.load %arg2[%c6] : memref<18xf32, #tpu.memory_space<smem>>
    %17 = vector.broadcast %16 : f32 to vector<1x128xf32>
    %c7 = arith.constant 7 : index
    %18 = memref.load %arg2[%c7] : memref<18xf32, #tpu.memory_space<smem>>
    %19 = vector.broadcast %18 : f32 to vector<1x128xf32>
    %c8 = arith.constant 8 : index
    %20 = memref.load %arg2[%c8] : memref<18xf32, #tpu.memory_space<smem>>
    %21 = vector.broadcast %20 : f32 to vector<1x128xf32>
    %c9 = arith.constant 9 : index
    %22 = memref.load %arg2[%c9] : memref<18xf32, #tpu.memory_space<smem>>
    %23 = vector.broadcast %22 : f32 to vector<1x128xf32>
    %c10 = arith.constant 10 : index
    %24 = memref.load %arg2[%c10] : memref<18xf32, #tpu.memory_space<smem>>
    %25 = vector.broadcast %24 : f32 to vector<1x128xf32>
    %c11 = arith.constant 11 : index
    %26 = memref.load %arg2[%c11] : memref<18xf32, #tpu.memory_space<smem>>
    %27 = vector.broadcast %26 : f32 to vector<1x128xf32>
    %c12 = arith.constant 12 : index
    %28 = memref.load %arg2[%c12] : memref<18xf32, #tpu.memory_space<smem>>
    %29 = vector.broadcast %28 : f32 to vector<1x128xf32>
    %c13 = arith.constant 13 : index
    %30 = memref.load %arg2[%c13] : memref<18xf32, #tpu.memory_space<smem>>
    %31 = vector.broadcast %30 : f32 to vector<1x128xf32>
    %c14 = arith.constant 14 : index
    %32 = memref.load %arg2[%c14] : memref<18xf32, #tpu.memory_space<smem>>
    %33 = vector.broadcast %32 : f32 to vector<1x128xf32>
    %c15 = arith.constant 15 : index
    %34 = memref.load %arg2[%c15] : memref<18xf32, #tpu.memory_space<smem>>
    %35 = vector.broadcast %34 : f32 to vector<1x128xf32>
    %c16 = arith.constant 16 : index
    %36 = memref.load %arg2[%c16] : memref<18xf32, #tpu.memory_space<smem>>
    %37 = vector.broadcast %36 : f32 to vector<1x128xf32>
    %c17 = arith.constant 17 : index
    %38 = memref.load %arg2[%c17] : memref<18xf32, #tpu.memory_space<smem>>
    %39 = vector.broadcast %38 : f32 to vector<1x128xf32>
    %c0_6 = arith.constant 0 : index
    %40 = memref.load %arg3[%c0_6] : memref<9xf32, #tpu.memory_space<smem>>
    %41 = vector.broadcast %40 : f32 to vector<1x128xf32>
    %c1_7 = arith.constant 1 : index
    %42 = memref.load %arg3[%c1_7] : memref<9xf32, #tpu.memory_space<smem>>
    %43 = vector.broadcast %42 : f32 to vector<1x128xf32>
    %c2_8 = arith.constant 2 : index
    %44 = memref.load %arg3[%c2_8] : memref<9xf32, #tpu.memory_space<smem>>
    %45 = vector.broadcast %44 : f32 to vector<1x128xf32>
    %c3_9 = arith.constant 3 : index
    %46 = memref.load %arg3[%c3_9] : memref<9xf32, #tpu.memory_space<smem>>
    %47 = vector.broadcast %46 : f32 to vector<1x128xf32>
    %c4_10 = arith.constant 4 : index
    %48 = memref.load %arg3[%c4_10] : memref<9xf32, #tpu.memory_space<smem>>
    %49 = vector.broadcast %48 : f32 to vector<1x128xf32>
    %c5_11 = arith.constant 5 : index
    %50 = memref.load %arg3[%c5_11] : memref<9xf32, #tpu.memory_space<smem>>
    %51 = vector.broadcast %50 : f32 to vector<1x128xf32>
    %c6_12 = arith.constant 6 : index
    %52 = memref.load %arg3[%c6_12] : memref<9xf32, #tpu.memory_space<smem>>
    %53 = vector.broadcast %52 : f32 to vector<1x128xf32>
    %c7_13 = arith.constant 7 : index
    %54 = memref.load %arg3[%c7_13] : memref<9xf32, #tpu.memory_space<smem>>
    %55 = vector.broadcast %54 : f32 to vector<1x128xf32>
    %c8_14 = arith.constant 8 : index
    %56 = memref.load %arg3[%c8_14] : memref<9xf32, #tpu.memory_space<smem>>
    %57 = vector.broadcast %56 : f32 to vector<1x128xf32>
    %c0_15 = arith.constant 0 : index
    %58 = memref.load %arg4[%c0_15] : memref<81xf32, #tpu.memory_space<smem>>
    %59 = vector.broadcast %58 : f32 to vector<1x128xf32>
    %c1_16 = arith.constant 1 : index
    %60 = memref.load %arg4[%c1_16] : memref<81xf32, #tpu.memory_space<smem>>
    %61 = vector.broadcast %60 : f32 to vector<1x128xf32>
    %c2_17 = arith.constant 2 : index
    %62 = memref.load %arg4[%c2_17] : memref<81xf32, #tpu.memory_space<smem>>
    %63 = vector.broadcast %62 : f32 to vector<1x128xf32>
    %c3_18 = arith.constant 3 : index
    %64 = memref.load %arg4[%c3_18] : memref<81xf32, #tpu.memory_space<smem>>
    %65 = vector.broadcast %64 : f32 to vector<1x128xf32>
    %c4_19 = arith.constant 4 : index
    %66 = memref.load %arg4[%c4_19] : memref<81xf32, #tpu.memory_space<smem>>
    %67 = vector.broadcast %66 : f32 to vector<1x128xf32>
    %c5_20 = arith.constant 5 : index
    %68 = memref.load %arg4[%c5_20] : memref<81xf32, #tpu.memory_space<smem>>
    %69 = vector.broadcast %68 : f32 to vector<1x128xf32>
    %c6_21 = arith.constant 6 : index
    %70 = memref.load %arg4[%c6_21] : memref<81xf32, #tpu.memory_space<smem>>
    %71 = vector.broadcast %70 : f32 to vector<1x128xf32>
    %c7_22 = arith.constant 7 : index
    %72 = memref.load %arg4[%c7_22] : memref<81xf32, #tpu.memory_space<smem>>
    %73 = vector.broadcast %72 : f32 to vector<1x128xf32>
    %c8_23 = arith.constant 8 : index
    %74 = memref.load %arg4[%c8_23] : memref<81xf32, #tpu.memory_space<smem>>
    %75 = vector.broadcast %74 : f32 to vector<1x128xf32>
    %c9_24 = arith.constant 9 : index
    %76 = memref.load %arg4[%c9_24] : memref<81xf32, #tpu.memory_space<smem>>
    %77 = vector.broadcast %76 : f32 to vector<1x128xf32>
    %c10_25 = arith.constant 10 : index
    %78 = memref.load %arg4[%c10_25] : memref<81xf32, #tpu.memory_space<smem>>
    %79 = vector.broadcast %78 : f32 to vector<1x128xf32>
    %c11_26 = arith.constant 11 : index
    %80 = memref.load %arg4[%c11_26] : memref<81xf32, #tpu.memory_space<smem>>
    %81 = vector.broadcast %80 : f32 to vector<1x128xf32>
    %c12_27 = arith.constant 12 : index
    %82 = memref.load %arg4[%c12_27] : memref<81xf32, #tpu.memory_space<smem>>
    %83 = vector.broadcast %82 : f32 to vector<1x128xf32>
    %c13_28 = arith.constant 13 : index
    %84 = memref.load %arg4[%c13_28] : memref<81xf32, #tpu.memory_space<smem>>
    %85 = vector.broadcast %84 : f32 to vector<1x128xf32>
    %c14_29 = arith.constant 14 : index
    %86 = memref.load %arg4[%c14_29] : memref<81xf32, #tpu.memory_space<smem>>
    %87 = vector.broadcast %86 : f32 to vector<1x128xf32>
    %c15_30 = arith.constant 15 : index
    %88 = memref.load %arg4[%c15_30] : memref<81xf32, #tpu.memory_space<smem>>
    %89 = vector.broadcast %88 : f32 to vector<1x128xf32>
    %c16_31 = arith.constant 16 : index
    %90 = memref.load %arg4[%c16_31] : memref<81xf32, #tpu.memory_space<smem>>
    %91 = vector.broadcast %90 : f32 to vector<1x128xf32>
    %c17_32 = arith.constant 17 : index
    %92 = memref.load %arg4[%c17_32] : memref<81xf32, #tpu.memory_space<smem>>
    %93 = vector.broadcast %92 : f32 to vector<1x128xf32>
    %c18 = arith.constant 18 : index
    %94 = memref.load %arg4[%c18] : memref<81xf32, #tpu.memory_space<smem>>
    %95 = vector.broadcast %94 : f32 to vector<1x128xf32>
    %c19 = arith.constant 19 : index
    %96 = memref.load %arg4[%c19] : memref<81xf32, #tpu.memory_space<smem>>
    %97 = vector.broadcast %96 : f32 to vector<1x128xf32>
    %c20 = arith.constant 20 : index
    %98 = memref.load %arg4[%c20] : memref<81xf32, #tpu.memory_space<smem>>
    %99 = vector.broadcast %98 : f32 to vector<1x128xf32>
    %c21 = arith.constant 21 : index
    %100 = memref.load %arg4[%c21] : memref<81xf32, #tpu.memory_space<smem>>
    %101 = vector.broadcast %100 : f32 to vector<1x128xf32>
    %c22 = arith.constant 22 : index
    %102 = memref.load %arg4[%c22] : memref<81xf32, #tpu.memory_space<smem>>
    %103 = vector.broadcast %102 : f32 to vector<1x128xf32>
    %c23 = arith.constant 23 : index
    %104 = memref.load %arg4[%c23] : memref<81xf32, #tpu.memory_space<smem>>
    %105 = vector.broadcast %104 : f32 to vector<1x128xf32>
    %c24 = arith.constant 24 : index
    %106 = memref.load %arg4[%c24] : memref<81xf32, #tpu.memory_space<smem>>
    %107 = vector.broadcast %106 : f32 to vector<1x128xf32>
    %c25 = arith.constant 25 : index
    %108 = memref.load %arg4[%c25] : memref<81xf32, #tpu.memory_space<smem>>
    %109 = vector.broadcast %108 : f32 to vector<1x128xf32>
    %c26 = arith.constant 26 : index
    %110 = memref.load %arg4[%c26] : memref<81xf32, #tpu.memory_space<smem>>
    %111 = vector.broadcast %110 : f32 to vector<1x128xf32>
    %c27 = arith.constant 27 : index
    %112 = memref.load %arg4[%c27] : memref<81xf32, #tpu.memory_space<smem>>
    %113 = vector.broadcast %112 : f32 to vector<1x128xf32>
    %c28 = arith.constant 28 : index
    %114 = memref.load %arg4[%c28] : memref<81xf32, #tpu.memory_space<smem>>
    %115 = vector.broadcast %114 : f32 to vector<1x128xf32>
    %c29 = arith.constant 29 : index
    %116 = memref.load %arg4[%c29] : memref<81xf32, #tpu.memory_space<smem>>
    %117 = vector.broadcast %116 : f32 to vector<1x128xf32>
    %c30 = arith.constant 30 : index
    %118 = memref.load %arg4[%c30] : memref<81xf32, #tpu.memory_space<smem>>
    %119 = vector.broadcast %118 : f32 to vector<1x128xf32>
    %c31 = arith.constant 31 : index
    %120 = memref.load %arg4[%c31] : memref<81xf32, #tpu.memory_space<smem>>
    %121 = vector.broadcast %120 : f32 to vector<1x128xf32>
    %c32 = arith.constant 32 : index
    %122 = memref.load %arg4[%c32] : memref<81xf32, #tpu.memory_space<smem>>
    %123 = vector.broadcast %122 : f32 to vector<1x128xf32>
    %c33 = arith.constant 33 : index
    %124 = memref.load %arg4[%c33] : memref<81xf32, #tpu.memory_space<smem>>
    %125 = vector.broadcast %124 : f32 to vector<1x128xf32>
    %c34 = arith.constant 34 : index
    %126 = memref.load %arg4[%c34] : memref<81xf32, #tpu.memory_space<smem>>
    %127 = vector.broadcast %126 : f32 to vector<1x128xf32>
    %c35 = arith.constant 35 : index
    %128 = memref.load %arg4[%c35] : memref<81xf32, #tpu.memory_space<smem>>
    %129 = vector.broadcast %128 : f32 to vector<1x128xf32>
    %c36 = arith.constant 36 : index
    %130 = memref.load %arg4[%c36] : memref<81xf32, #tpu.memory_space<smem>>
    %131 = vector.broadcast %130 : f32 to vector<1x128xf32>
    %c37 = arith.constant 37 : index
    %132 = memref.load %arg4[%c37] : memref<81xf32, #tpu.memory_space<smem>>
    %133 = vector.broadcast %132 : f32 to vector<1x128xf32>
    %c38 = arith.constant 38 : index
    %134 = memref.load %arg4[%c38] : memref<81xf32, #tpu.memory_space<smem>>
    %135 = vector.broadcast %134 : f32 to vector<1x128xf32>
    %c39 = arith.constant 39 : index
    %136 = memref.load %arg4[%c39] : memref<81xf32, #tpu.memory_space<smem>>
    %137 = vector.broadcast %136 : f32 to vector<1x128xf32>
    %c40 = arith.constant 40 : index
    %138 = memref.load %arg4[%c40] : memref<81xf32, #tpu.memory_space<smem>>
    %139 = vector.broadcast %138 : f32 to vector<1x128xf32>
    %c41 = arith.constant 41 : index
    %140 = memref.load %arg4[%c41] : memref<81xf32, #tpu.memory_space<smem>>
    %141 = vector.broadcast %140 : f32 to vector<1x128xf32>
    %c42 = arith.constant 42 : index
    %142 = memref.load %arg4[%c42] : memref<81xf32, #tpu.memory_space<smem>>
    %143 = vector.broadcast %142 : f32 to vector<1x128xf32>
    %c43 = arith.constant 43 : index
    %144 = memref.load %arg4[%c43] : memref<81xf32, #tpu.memory_space<smem>>
    %145 = vector.broadcast %144 : f32 to vector<1x128xf32>
    %c44 = arith.constant 44 : index
    %146 = memref.load %arg4[%c44] : memref<81xf32, #tpu.memory_space<smem>>
    %147 = vector.broadcast %146 : f32 to vector<1x128xf32>
    %c45 = arith.constant 45 : index
    %148 = memref.load %arg4[%c45] : memref<81xf32, #tpu.memory_space<smem>>
    %149 = vector.broadcast %148 : f32 to vector<1x128xf32>
    %c46 = arith.constant 46 : index
    %150 = memref.load %arg4[%c46] : memref<81xf32, #tpu.memory_space<smem>>
    %151 = vector.broadcast %150 : f32 to vector<1x128xf32>
    %c47 = arith.constant 47 : index
    %152 = memref.load %arg4[%c47] : memref<81xf32, #tpu.memory_space<smem>>
    %153 = vector.broadcast %152 : f32 to vector<1x128xf32>
    %c48 = arith.constant 48 : index
    %154 = memref.load %arg4[%c48] : memref<81xf32, #tpu.memory_space<smem>>
    %155 = vector.broadcast %154 : f32 to vector<1x128xf32>
    %c49 = arith.constant 49 : index
    %156 = memref.load %arg4[%c49] : memref<81xf32, #tpu.memory_space<smem>>
    %157 = vector.broadcast %156 : f32 to vector<1x128xf32>
    %c50 = arith.constant 50 : index
    %158 = memref.load %arg4[%c50] : memref<81xf32, #tpu.memory_space<smem>>
    %159 = vector.broadcast %158 : f32 to vector<1x128xf32>
    %c51 = arith.constant 51 : index
    %160 = memref.load %arg4[%c51] : memref<81xf32, #tpu.memory_space<smem>>
    %161 = vector.broadcast %160 : f32 to vector<1x128xf32>
    %c52 = arith.constant 52 : index
    %162 = memref.load %arg4[%c52] : memref<81xf32, #tpu.memory_space<smem>>
    %163 = vector.broadcast %162 : f32 to vector<1x128xf32>
    %c53 = arith.constant 53 : index
    %164 = memref.load %arg4[%c53] : memref<81xf32, #tpu.memory_space<smem>>
    %165 = vector.broadcast %164 : f32 to vector<1x128xf32>
    %c54 = arith.constant 54 : index
    %166 = memref.load %arg4[%c54] : memref<81xf32, #tpu.memory_space<smem>>
    %167 = vector.broadcast %166 : f32 to vector<1x128xf32>
    %c55 = arith.constant 55 : index
    %168 = memref.load %arg4[%c55] : memref<81xf32, #tpu.memory_space<smem>>
    %169 = vector.broadcast %168 : f32 to vector<1x128xf32>
    %c56 = arith.constant 56 : index
    %170 = memref.load %arg4[%c56] : memref<81xf32, #tpu.memory_space<smem>>
    %171 = vector.broadcast %170 : f32 to vector<1x128xf32>
    %c57 = arith.constant 57 : index
    %172 = memref.load %arg4[%c57] : memref<81xf32, #tpu.memory_space<smem>>
    %173 = vector.broadcast %172 : f32 to vector<1x128xf32>
    %c58 = arith.constant 58 : index
    %174 = memref.load %arg4[%c58] : memref<81xf32, #tpu.memory_space<smem>>
    %175 = vector.broadcast %174 : f32 to vector<1x128xf32>
    %c59 = arith.constant 59 : index
    %176 = memref.load %arg4[%c59] : memref<81xf32, #tpu.memory_space<smem>>
    %177 = vector.broadcast %176 : f32 to vector<1x128xf32>
    %c60 = arith.constant 60 : index
    %178 = memref.load %arg4[%c60] : memref<81xf32, #tpu.memory_space<smem>>
    %179 = vector.broadcast %178 : f32 to vector<1x128xf32>
    %c61 = arith.constant 61 : index
    %180 = memref.load %arg4[%c61] : memref<81xf32, #tpu.memory_space<smem>>
    %181 = vector.broadcast %180 : f32 to vector<1x128xf32>
    %c62 = arith.constant 62 : index
    %182 = memref.load %arg4[%c62] : memref<81xf32, #tpu.memory_space<smem>>
    %183 = vector.broadcast %182 : f32 to vector<1x128xf32>
    %c63 = arith.constant 63 : index
    %184 = memref.load %arg4[%c63] : memref<81xf32, #tpu.memory_space<smem>>
    %185 = vector.broadcast %184 : f32 to vector<1x128xf32>
    %c64 = arith.constant 64 : index
    %186 = memref.load %arg4[%c64] : memref<81xf32, #tpu.memory_space<smem>>
    %187 = vector.broadcast %186 : f32 to vector<1x128xf32>
    %c65 = arith.constant 65 : index
    %188 = memref.load %arg4[%c65] : memref<81xf32, #tpu.memory_space<smem>>
    %189 = vector.broadcast %188 : f32 to vector<1x128xf32>
    %c66 = arith.constant 66 : index
    %190 = memref.load %arg4[%c66] : memref<81xf32, #tpu.memory_space<smem>>
    %191 = vector.broadcast %190 : f32 to vector<1x128xf32>
    %c67 = arith.constant 67 : index
    %192 = memref.load %arg4[%c67] : memref<81xf32, #tpu.memory_space<smem>>
    %193 = vector.broadcast %192 : f32 to vector<1x128xf32>
    %c68 = arith.constant 68 : index
    %194 = memref.load %arg4[%c68] : memref<81xf32, #tpu.memory_space<smem>>
    %195 = vector.broadcast %194 : f32 to vector<1x128xf32>
    %c69 = arith.constant 69 : index
    %196 = memref.load %arg4[%c69] : memref<81xf32, #tpu.memory_space<smem>>
    %197 = vector.broadcast %196 : f32 to vector<1x128xf32>
    %c70 = arith.constant 70 : index
    %198 = memref.load %arg4[%c70] : memref<81xf32, #tpu.memory_space<smem>>
    %199 = vector.broadcast %198 : f32 to vector<1x128xf32>
    %c71 = arith.constant 71 : index
    %200 = memref.load %arg4[%c71] : memref<81xf32, #tpu.memory_space<smem>>
    %201 = vector.broadcast %200 : f32 to vector<1x128xf32>
    %c72 = arith.constant 72 : index
    %202 = memref.load %arg4[%c72] : memref<81xf32, #tpu.memory_space<smem>>
    %203 = vector.broadcast %202 : f32 to vector<1x128xf32>
    %c73 = arith.constant 73 : index
    %204 = memref.load %arg4[%c73] : memref<81xf32, #tpu.memory_space<smem>>
    %205 = vector.broadcast %204 : f32 to vector<1x128xf32>
    %c74 = arith.constant 74 : index
    %206 = memref.load %arg4[%c74] : memref<81xf32, #tpu.memory_space<smem>>
    %207 = vector.broadcast %206 : f32 to vector<1x128xf32>
    %c75 = arith.constant 75 : index
    %208 = memref.load %arg4[%c75] : memref<81xf32, #tpu.memory_space<smem>>
    %209 = vector.broadcast %208 : f32 to vector<1x128xf32>
    %c76 = arith.constant 76 : index
    %210 = memref.load %arg4[%c76] : memref<81xf32, #tpu.memory_space<smem>>
    %211 = vector.broadcast %210 : f32 to vector<1x128xf32>
    %c77 = arith.constant 77 : index
    %212 = memref.load %arg4[%c77] : memref<81xf32, #tpu.memory_space<smem>>
    %213 = vector.broadcast %212 : f32 to vector<1x128xf32>
    %c78 = arith.constant 78 : index
    %214 = memref.load %arg4[%c78] : memref<81xf32, #tpu.memory_space<smem>>
    %215 = vector.broadcast %214 : f32 to vector<1x128xf32>
    %c79 = arith.constant 79 : index
    %216 = memref.load %arg4[%c79] : memref<81xf32, #tpu.memory_space<smem>>
    %217 = vector.broadcast %216 : f32 to vector<1x128xf32>
    %c80 = arith.constant 80 : index
    %218 = memref.load %arg4[%c80] : memref<81xf32, #tpu.memory_space<smem>>
    %219 = vector.broadcast %218 : f32 to vector<1x128xf32>
    %c0_33 = arith.constant 0 : index
    %220 = memref.load %arg5[%c0_33] : memref<9xf32, #tpu.memory_space<smem>>
    %221 = vector.broadcast %220 : f32 to vector<1x128xf32>
    %c1_34 = arith.constant 1 : index
    %222 = memref.load %arg5[%c1_34] : memref<9xf32, #tpu.memory_space<smem>>
    %223 = vector.broadcast %222 : f32 to vector<1x128xf32>
    %c2_35 = arith.constant 2 : index
    %224 = memref.load %arg5[%c2_35] : memref<9xf32, #tpu.memory_space<smem>>
    %225 = vector.broadcast %224 : f32 to vector<1x128xf32>
    %c3_36 = arith.constant 3 : index
    %226 = memref.load %arg5[%c3_36] : memref<9xf32, #tpu.memory_space<smem>>
    %227 = vector.broadcast %226 : f32 to vector<1x128xf32>
    %c4_37 = arith.constant 4 : index
    %228 = memref.load %arg5[%c4_37] : memref<9xf32, #tpu.memory_space<smem>>
    %229 = vector.broadcast %228 : f32 to vector<1x128xf32>
    %c5_38 = arith.constant 5 : index
    %230 = memref.load %arg5[%c5_38] : memref<9xf32, #tpu.memory_space<smem>>
    %231 = vector.broadcast %230 : f32 to vector<1x128xf32>
    %c6_39 = arith.constant 6 : index
    %232 = memref.load %arg5[%c6_39] : memref<9xf32, #tpu.memory_space<smem>>
    %233 = vector.broadcast %232 : f32 to vector<1x128xf32>
    %c7_40 = arith.constant 7 : index
    %234 = memref.load %arg5[%c7_40] : memref<9xf32, #tpu.memory_space<smem>>
    %235 = vector.broadcast %234 : f32 to vector<1x128xf32>
    %c8_41 = arith.constant 8 : index
    %236 = memref.load %arg5[%c8_41] : memref<9xf32, #tpu.memory_space<smem>>
    %237 = vector.broadcast %236 : f32 to vector<1x128xf32>
    %238 = vector.broadcast %5 : vector<1x128xf32> to vector<8x128xf32>
    %239 = arith.mulf %238, %1 : vector<8x128xf32>
    %240 = vector.broadcast %7 : vector<1x128xf32> to vector<8x128xf32>
    %241 = arith.mulf %240, %3 : vector<8x128xf32>
    %242 = arith.addf %239, %241 : vector<8x128xf32>
    %243 = vector.broadcast %41 : vector<1x128xf32> to vector<8x128xf32>
    %244 = arith.addf %242, %243 : vector<8x128xf32>
    %cst = arith.constant 0.000000e+00 : f32
    %245 = vector.broadcast %cst : f32 to vector<8x128xf32>
    %246 = arith.maximumf %244, %245 : vector<8x128xf32>
    %247 = vector.broadcast %9 : vector<1x128xf32> to vector<8x128xf32>
    %248 = arith.mulf %247, %1 : vector<8x128xf32>
    %249 = vector.broadcast %11 : vector<1x128xf32> to vector<8x128xf32>
    %250 = arith.mulf %249, %3 : vector<8x128xf32>
    %251 = arith.addf %248, %250 : vector<8x128xf32>
    %252 = vector.broadcast %43 : vector<1x128xf32> to vector<8x128xf32>
    %253 = arith.addf %251, %252 : vector<8x128xf32>
    %cst_42 = arith.constant 0.000000e+00 : f32
    %254 = vector.broadcast %cst_42 : f32 to vector<8x128xf32>
    %255 = arith.maximumf %253, %254 : vector<8x128xf32>
    %256 = vector.broadcast %13 : vector<1x128xf32> to vector<8x128xf32>
    %257 = arith.mulf %256, %1 : vector<8x128xf32>
    %258 = vector.broadcast %15 : vector<1x128xf32> to vector<8x128xf32>
    %259 = arith.mulf %258, %3 : vector<8x128xf32>
    %260 = arith.addf %257, %259 : vector<8x128xf32>
    %261 = vector.broadcast %45 : vector<1x128xf32> to vector<8x128xf32>
    %262 = arith.addf %260, %261 : vector<8x128xf32>
    %cst_43 = arith.constant 0.000000e+00 : f32
    %263 = vector.broadcast %cst_43 : f32 to vector<8x128xf32>
    %264 = arith.maximumf %262, %263 : vector<8x128xf32>
    %265 = vector.broadcast %17 : vector<1x128xf32> to vector<8x128xf32>
    %266 = arith.mulf %265, %1 : vector<8x128xf32>
    %267 = vector.broadcast %19 : vector<1x128xf32> to vector<8x128xf32>
    %268 = arith.mulf %267, %3 : vector<8x128xf32>
    %269 = arith.addf %266, %268 : vector<8x128xf32>
    %270 = vector.broadcast %47 : vector<1x128xf32> to vector<8x128xf32>
    %271 = arith.addf %269, %270 : vector<8x128xf32>
    %cst_44 = arith.constant 0.000000e+00 : f32
    %272 = vector.broadcast %cst_44 : f32 to vector<8x128xf32>
    %273 = arith.maximumf %271, %272 : vector<8x128xf32>
    %274 = vector.broadcast %21 : vector<1x128xf32> to vector<8x128xf32>
    %275 = arith.mulf %274, %1 : vector<8x128xf32>
    %276 = vector.broadcast %23 : vector<1x128xf32> to vector<8x128xf32>
    %277 = arith.mulf %276, %3 : vector<8x128xf32>
    %278 = arith.addf %275, %277 : vector<8x128xf32>
    %279 = vector.broadcast %49 : vector<1x128xf32> to vector<8x128xf32>
    %280 = arith.addf %278, %279 : vector<8x128xf32>
    %cst_45 = arith.constant 0.000000e+00 : f32
    %281 = vector.broadcast %cst_45 : f32 to vector<8x128xf32>
    %282 = arith.maximumf %280, %281 : vector<8x128xf32>
    %283 = vector.broadcast %25 : vector<1x128xf32> to vector<8x128xf32>
    %284 = arith.mulf %283, %1 : vector<8x128xf32>
    %285 = vector.broadcast %27 : vector<1x128xf32> to vector<8x128xf32>
    %286 = arith.mulf %285, %3 : vector<8x128xf32>
    %287 = arith.addf %284, %286 : vector<8x128xf32>
    %288 = vector.broadcast %51 : vector<1x128xf32> to vector<8x128xf32>
    %289 = arith.addf %287, %288 : vector<8x128xf32>
    %cst_46 = arith.constant 0.000000e+00 : f32
    %290 = vector.broadcast %cst_46 : f32 to vector<8x128xf32>
    %291 = arith.maximumf %289, %290 : vector<8x128xf32>
    %292 = vector.broadcast %29 : vector<1x128xf32> to vector<8x128xf32>
    %293 = arith.mulf %292, %1 : vector<8x128xf32>
    %294 = vector.broadcast %31 : vector<1x128xf32> to vector<8x128xf32>
    %295 = arith.mulf %294, %3 : vector<8x128xf32>
    %296 = arith.addf %293, %295 : vector<8x128xf32>
    %297 = vector.broadcast %53 : vector<1x128xf32> to vector<8x128xf32>
    %298 = arith.addf %296, %297 : vector<8x128xf32>
    %cst_47 = arith.constant 0.000000e+00 : f32
    %299 = vector.broadcast %cst_47 : f32 to vector<8x128xf32>
    %300 = arith.maximumf %298, %299 : vector<8x128xf32>
    %301 = vector.broadcast %33 : vector<1x128xf32> to vector<8x128xf32>
    %302 = arith.mulf %301, %1 : vector<8x128xf32>
    %303 = vector.broadcast %35 : vector<1x128xf32> to vector<8x128xf32>
    %304 = arith.mulf %303, %3 : vector<8x128xf32>
    %305 = arith.addf %302, %304 : vector<8x128xf32>
    %306 = vector.broadcast %55 : vector<1x128xf32> to vector<8x128xf32>
    %307 = arith.addf %305, %306 : vector<8x128xf32>
    %cst_48 = arith.constant 0.000000e+00 : f32
    %308 = vector.broadcast %cst_48 : f32 to vector<8x128xf32>
    %309 = arith.maximumf %307, %308 : vector<8x128xf32>
    %310 = vector.broadcast %37 : vector<1x128xf32> to vector<8x128xf32>
    %311 = arith.mulf %310, %1 : vector<8x128xf32>
    %312 = vector.broadcast %39 : vector<1x128xf32> to vector<8x128xf32>
    %313 = arith.mulf %312, %3 : vector<8x128xf32>
    %314 = arith.addf %311, %313 : vector<8x128xf32>
    %315 = vector.broadcast %57 : vector<1x128xf32> to vector<8x128xf32>
    %316 = arith.addf %314, %315 : vector<8x128xf32>
    %cst_49 = arith.constant 0.000000e+00 : f32
    %317 = vector.broadcast %cst_49 : f32 to vector<8x128xf32>
    %318 = arith.maximumf %316, %317 : vector<8x128xf32>
    %319 = vector.broadcast %59 : vector<1x128xf32> to vector<8x128xf32>
    %320 = arith.mulf %246, %319 : vector<8x128xf32>
    %321 = vector.broadcast %61 : vector<1x128xf32> to vector<8x128xf32>
    %322 = arith.mulf %255, %321 : vector<8x128xf32>
    %323 = arith.addf %320, %322 : vector<8x128xf32>
    %324 = vector.broadcast %63 : vector<1x128xf32> to vector<8x128xf32>
    %325 = arith.mulf %264, %324 : vector<8x128xf32>
    %326 = arith.addf %323, %325 : vector<8x128xf32>
    %327 = vector.broadcast %65 : vector<1x128xf32> to vector<8x128xf32>
    %328 = arith.mulf %273, %327 : vector<8x128xf32>
    %329 = arith.addf %326, %328 : vector<8x128xf32>
    %330 = vector.broadcast %67 : vector<1x128xf32> to vector<8x128xf32>
    %331 = arith.mulf %282, %330 : vector<8x128xf32>
    %332 = arith.addf %329, %331 : vector<8x128xf32>
    %333 = vector.broadcast %69 : vector<1x128xf32> to vector<8x128xf32>
    %334 = arith.mulf %291, %333 : vector<8x128xf32>
    %335 = arith.addf %332, %334 : vector<8x128xf32>
    %336 = vector.broadcast %71 : vector<1x128xf32> to vector<8x128xf32>
    %337 = arith.mulf %300, %336 : vector<8x128xf32>
    %338 = arith.addf %335, %337 : vector<8x128xf32>
    %339 = vector.broadcast %73 : vector<1x128xf32> to vector<8x128xf32>
    %340 = arith.mulf %309, %339 : vector<8x128xf32>
    %341 = arith.addf %338, %340 : vector<8x128xf32>
    %342 = vector.broadcast %75 : vector<1x128xf32> to vector<8x128xf32>
    %343 = arith.mulf %318, %342 : vector<8x128xf32>
    %344 = arith.addf %341, %343 : vector<8x128xf32>
    %345 = vector.broadcast %221 : vector<1x128xf32> to vector<8x128xf32>
    %346 = arith.addf %344, %345 : vector<8x128xf32>
    %cst_50 = arith.constant 0.000000e+00 : f32
    %347 = vector.broadcast %cst_50 : f32 to vector<8x128xf32>
    %348 = arith.maximumf %346, %347 : vector<8x128xf32>
    %c0_51 = arith.constant 0 : index
    %349 = memref.load %arg6[%c0_51] : memref<9xf32, #tpu.memory_space<smem>>
    %350 = vector.broadcast %349 : f32 to vector<8x128xf32>
    %351 = arith.mulf %348, %350 : vector<8x128xf32>
    %352 = vector.broadcast %77 : vector<1x128xf32> to vector<8x128xf32>
    %353 = arith.mulf %246, %352 : vector<8x128xf32>
    %354 = vector.broadcast %79 : vector<1x128xf32> to vector<8x128xf32>
    %355 = arith.mulf %255, %354 : vector<8x128xf32>
    %356 = arith.addf %353, %355 : vector<8x128xf32>
    %357 = vector.broadcast %81 : vector<1x128xf32> to vector<8x128xf32>
    %358 = arith.mulf %264, %357 : vector<8x128xf32>
    %359 = arith.addf %356, %358 : vector<8x128xf32>
    %360 = vector.broadcast %83 : vector<1x128xf32> to vector<8x128xf32>
    %361 = arith.mulf %273, %360 : vector<8x128xf32>
    %362 = arith.addf %359, %361 : vector<8x128xf32>
    %363 = vector.broadcast %85 : vector<1x128xf32> to vector<8x128xf32>
    %364 = arith.mulf %282, %363 : vector<8x128xf32>
    %365 = arith.addf %362, %364 : vector<8x128xf32>
    %366 = vector.broadcast %87 : vector<1x128xf32> to vector<8x128xf32>
    %367 = arith.mulf %291, %366 : vector<8x128xf32>
    %368 = arith.addf %365, %367 : vector<8x128xf32>
    %369 = vector.broadcast %89 : vector<1x128xf32> to vector<8x128xf32>
    %370 = arith.mulf %300, %369 : vector<8x128xf32>
    %371 = arith.addf %368, %370 : vector<8x128xf32>
    %372 = vector.broadcast %91 : vector<1x128xf32> to vector<8x128xf32>
    %373 = arith.mulf %309, %372 : vector<8x128xf32>
    %374 = arith.addf %371, %373 : vector<8x128xf32>
    %375 = vector.broadcast %93 : vector<1x128xf32> to vector<8x128xf32>
    %376 = arith.mulf %318, %375 : vector<8x128xf32>
    %377 = arith.addf %374, %376 : vector<8x128xf32>
    %378 = vector.broadcast %223 : vector<1x128xf32> to vector<8x128xf32>
    %379 = arith.addf %377, %378 : vector<8x128xf32>
    %cst_52 = arith.constant 0.000000e+00 : f32
    %380 = vector.broadcast %cst_52 : f32 to vector<8x128xf32>
    %381 = arith.maximumf %379, %380 : vector<8x128xf32>
    %c1_53 = arith.constant 1 : index
    %382 = memref.load %arg6[%c1_53] : memref<9xf32, #tpu.memory_space<smem>>
    %383 = vector.broadcast %382 : f32 to vector<8x128xf32>
    %384 = arith.mulf %381, %383 : vector<8x128xf32>
    %385 = arith.addf %351, %384 : vector<8x128xf32>
    %386 = vector.broadcast %95 : vector<1x128xf32> to vector<8x128xf32>
    %387 = arith.mulf %246, %386 : vector<8x128xf32>
    %388 = vector.broadcast %97 : vector<1x128xf32> to vector<8x128xf32>
    %389 = arith.mulf %255, %388 : vector<8x128xf32>
    %390 = arith.addf %387, %389 : vector<8x128xf32>
    %391 = vector.broadcast %99 : vector<1x128xf32> to vector<8x128xf32>
    %392 = arith.mulf %264, %391 : vector<8x128xf32>
    %393 = arith.addf %390, %392 : vector<8x128xf32>
    %394 = vector.broadcast %101 : vector<1x128xf32> to vector<8x128xf32>
    %395 = arith.mulf %273, %394 : vector<8x128xf32>
    %396 = arith.addf %393, %395 : vector<8x128xf32>
    %397 = vector.broadcast %103 : vector<1x128xf32> to vector<8x128xf32>
    %398 = arith.mulf %282, %397 : vector<8x128xf32>
    %399 = arith.addf %396, %398 : vector<8x128xf32>
    %400 = vector.broadcast %105 : vector<1x128xf32> to vector<8x128xf32>
    %401 = arith.mulf %291, %400 : vector<8x128xf32>
    %402 = arith.addf %399, %401 : vector<8x128xf32>
    %403 = vector.broadcast %107 : vector<1x128xf32> to vector<8x128xf32>
    %404 = arith.mulf %300, %403 : vector<8x128xf32>
    %405 = arith.addf %402, %404 : vector<8x128xf32>
    %406 = vector.broadcast %109 : vector<1x128xf32> to vector<8x128xf32>
    %407 = arith.mulf %309, %406 : vector<8x128xf32>
    %408 = arith.addf %405, %407 : vector<8x128xf32>
    %409 = vector.broadcast %111 : vector<1x128xf32> to vector<8x128xf32>
    %410 = arith.mulf %318, %409 : vector<8x128xf32>
    %411 = arith.addf %408, %410 : vector<8x128xf32>
    %412 = vector.broadcast %225 : vector<1x128xf32> to vector<8x128xf32>
    %413 = arith.addf %411, %412 : vector<8x128xf32>
    %cst_54 = arith.constant 0.000000e+00 : f32
    %414 = vector.broadcast %cst_54 : f32 to vector<8x128xf32>
    %415 = arith.maximumf %413, %414 : vector<8x128xf32>
    %c2_55 = arith.constant 2 : index
    %416 = memref.load %arg6[%c2_55] : memref<9xf32, #tpu.memory_space<smem>>
    %417 = vector.broadcast %416 : f32 to vector<8x128xf32>
    %418 = arith.mulf %415, %417 : vector<8x128xf32>
    %419 = arith.addf %385, %418 : vector<8x128xf32>
    %420 = vector.broadcast %113 : vector<1x128xf32> to vector<8x128xf32>
    %421 = arith.mulf %246, %420 : vector<8x128xf32>
    %422 = vector.broadcast %115 : vector<1x128xf32> to vector<8x128xf32>
    %423 = arith.mulf %255, %422 : vector<8x128xf32>
    %424 = arith.addf %421, %423 : vector<8x128xf32>
    %425 = vector.broadcast %117 : vector<1x128xf32> to vector<8x128xf32>
    %426 = arith.mulf %264, %425 : vector<8x128xf32>
    %427 = arith.addf %424, %426 : vector<8x128xf32>
    %428 = vector.broadcast %119 : vector<1x128xf32> to vector<8x128xf32>
    %429 = arith.mulf %273, %428 : vector<8x128xf32>
    %430 = arith.addf %427, %429 : vector<8x128xf32>
    %431 = vector.broadcast %121 : vector<1x128xf32> to vector<8x128xf32>
    %432 = arith.mulf %282, %431 : vector<8x128xf32>
    %433 = arith.addf %430, %432 : vector<8x128xf32>
    %434 = vector.broadcast %123 : vector<1x128xf32> to vector<8x128xf32>
    %435 = arith.mulf %291, %434 : vector<8x128xf32>
    %436 = arith.addf %433, %435 : vector<8x128xf32>
    %437 = vector.broadcast %125 : vector<1x128xf32> to vector<8x128xf32>
    %438 = arith.mulf %300, %437 : vector<8x128xf32>
    %439 = arith.addf %436, %438 : vector<8x128xf32>
    %440 = vector.broadcast %127 : vector<1x128xf32> to vector<8x128xf32>
    %441 = arith.mulf %309, %440 : vector<8x128xf32>
    %442 = arith.addf %439, %441 : vector<8x128xf32>
    %443 = vector.broadcast %129 : vector<1x128xf32> to vector<8x128xf32>
    %444 = arith.mulf %318, %443 : vector<8x128xf32>
    %445 = arith.addf %442, %444 : vector<8x128xf32>
    %446 = vector.broadcast %227 : vector<1x128xf32> to vector<8x128xf32>
    %447 = arith.addf %445, %446 : vector<8x128xf32>
    %cst_56 = arith.constant 0.000000e+00 : f32
    %448 = vector.broadcast %cst_56 : f32 to vector<8x128xf32>
    %449 = arith.maximumf %447, %448 : vector<8x128xf32>
    %c3_57 = arith.constant 3 : index
    %450 = memref.load %arg6[%c3_57] : memref<9xf32, #tpu.memory_space<smem>>
    %451 = vector.broadcast %450 : f32 to vector<8x128xf32>
    %452 = arith.mulf %449, %451 : vector<8x128xf32>
    %453 = arith.addf %419, %452 : vector<8x128xf32>
    %454 = vector.broadcast %131 : vector<1x128xf32> to vector<8x128xf32>
    %455 = arith.mulf %246, %454 : vector<8x128xf32>
    %456 = vector.broadcast %133 : vector<1x128xf32> to vector<8x128xf32>
    %457 = arith.mulf %255, %456 : vector<8x128xf32>
    %458 = arith.addf %455, %457 : vector<8x128xf32>
    %459 = vector.broadcast %135 : vector<1x128xf32> to vector<8x128xf32>
    %460 = arith.mulf %264, %459 : vector<8x128xf32>
    %461 = arith.addf %458, %460 : vector<8x128xf32>
    %462 = vector.broadcast %137 : vector<1x128xf32> to vector<8x128xf32>
    %463 = arith.mulf %273, %462 : vector<8x128xf32>
    %464 = arith.addf %461, %463 : vector<8x128xf32>
    %465 = vector.broadcast %139 : vector<1x128xf32> to vector<8x128xf32>
    %466 = arith.mulf %282, %465 : vector<8x128xf32>
    %467 = arith.addf %464, %466 : vector<8x128xf32>
    %468 = vector.broadcast %141 : vector<1x128xf32> to vector<8x128xf32>
    %469 = arith.mulf %291, %468 : vector<8x128xf32>
    %470 = arith.addf %467, %469 : vector<8x128xf32>
    %471 = vector.broadcast %143 : vector<1x128xf32> to vector<8x128xf32>
    %472 = arith.mulf %300, %471 : vector<8x128xf32>
    %473 = arith.addf %470, %472 : vector<8x128xf32>
    %474 = vector.broadcast %145 : vector<1x128xf32> to vector<8x128xf32>
    %475 = arith.mulf %309, %474 : vector<8x128xf32>
    %476 = arith.addf %473, %475 : vector<8x128xf32>
    %477 = vector.broadcast %147 : vector<1x128xf32> to vector<8x128xf32>
    %478 = arith.mulf %318, %477 : vector<8x128xf32>
    %479 = arith.addf %476, %478 : vector<8x128xf32>
    %480 = vector.broadcast %229 : vector<1x128xf32> to vector<8x128xf32>
    %481 = arith.addf %479, %480 : vector<8x128xf32>
    %cst_58 = arith.constant 0.000000e+00 : f32
    %482 = vector.broadcast %cst_58 : f32 to vector<8x128xf32>
    %483 = arith.maximumf %481, %482 : vector<8x128xf32>
    %c4_59 = arith.constant 4 : index
    %484 = memref.load %arg6[%c4_59] : memref<9xf32, #tpu.memory_space<smem>>
    %485 = vector.broadcast %484 : f32 to vector<8x128xf32>
    %486 = arith.mulf %483, %485 : vector<8x128xf32>
    %487 = arith.addf %453, %486 : vector<8x128xf32>
    %488 = vector.broadcast %149 : vector<1x128xf32> to vector<8x128xf32>
    %489 = arith.mulf %246, %488 : vector<8x128xf32>
    %490 = vector.broadcast %151 : vector<1x128xf32> to vector<8x128xf32>
    %491 = arith.mulf %255, %490 : vector<8x128xf32>
    %492 = arith.addf %489, %491 : vector<8x128xf32>
    %493 = vector.broadcast %153 : vector<1x128xf32> to vector<8x128xf32>
    %494 = arith.mulf %264, %493 : vector<8x128xf32>
    %495 = arith.addf %492, %494 : vector<8x128xf32>
    %496 = vector.broadcast %155 : vector<1x128xf32> to vector<8x128xf32>
    %497 = arith.mulf %273, %496 : vector<8x128xf32>
    %498 = arith.addf %495, %497 : vector<8x128xf32>
    %499 = vector.broadcast %157 : vector<1x128xf32> to vector<8x128xf32>
    %500 = arith.mulf %282, %499 : vector<8x128xf32>
    %501 = arith.addf %498, %500 : vector<8x128xf32>
    %502 = vector.broadcast %159 : vector<1x128xf32> to vector<8x128xf32>
    %503 = arith.mulf %291, %502 : vector<8x128xf32>
    %504 = arith.addf %501, %503 : vector<8x128xf32>
    %505 = vector.broadcast %161 : vector<1x128xf32> to vector<8x128xf32>
    %506 = arith.mulf %300, %505 : vector<8x128xf32>
    %507 = arith.addf %504, %506 : vector<8x128xf32>
    %508 = vector.broadcast %163 : vector<1x128xf32> to vector<8x128xf32>
    %509 = arith.mulf %309, %508 : vector<8x128xf32>
    %510 = arith.addf %507, %509 : vector<8x128xf32>
    %511 = vector.broadcast %165 : vector<1x128xf32> to vector<8x128xf32>
    %512 = arith.mulf %318, %511 : vector<8x128xf32>
    %513 = arith.addf %510, %512 : vector<8x128xf32>
    %514 = vector.broadcast %231 : vector<1x128xf32> to vector<8x128xf32>
    %515 = arith.addf %513, %514 : vector<8x128xf32>
    %cst_60 = arith.constant 0.000000e+00 : f32
    %516 = vector.broadcast %cst_60 : f32 to vector<8x128xf32>
    %517 = arith.maximumf %515, %516 : vector<8x128xf32>
    %c5_61 = arith.constant 5 : index
    %518 = memref.load %arg6[%c5_61] : memref<9xf32, #tpu.memory_space<smem>>
    %519 = vector.broadcast %518 : f32 to vector<8x128xf32>
    %520 = arith.mulf %517, %519 : vector<8x128xf32>
    %521 = arith.addf %487, %520 : vector<8x128xf32>
    %522 = vector.broadcast %167 : vector<1x128xf32> to vector<8x128xf32>
    %523 = arith.mulf %246, %522 : vector<8x128xf32>
    %524 = vector.broadcast %169 : vector<1x128xf32> to vector<8x128xf32>
    %525 = arith.mulf %255, %524 : vector<8x128xf32>
    %526 = arith.addf %523, %525 : vector<8x128xf32>
    %527 = vector.broadcast %171 : vector<1x128xf32> to vector<8x128xf32>
    %528 = arith.mulf %264, %527 : vector<8x128xf32>
    %529 = arith.addf %526, %528 : vector<8x128xf32>
    %530 = vector.broadcast %173 : vector<1x128xf32> to vector<8x128xf32>
    %531 = arith.mulf %273, %530 : vector<8x128xf32>
    %532 = arith.addf %529, %531 : vector<8x128xf32>
    %533 = vector.broadcast %175 : vector<1x128xf32> to vector<8x128xf32>
    %534 = arith.mulf %282, %533 : vector<8x128xf32>
    %535 = arith.addf %532, %534 : vector<8x128xf32>
    %536 = vector.broadcast %177 : vector<1x128xf32> to vector<8x128xf32>
    %537 = arith.mulf %291, %536 : vector<8x128xf32>
    %538 = arith.addf %535, %537 : vector<8x128xf32>
    %539 = vector.broadcast %179 : vector<1x128xf32> to vector<8x128xf32>
    %540 = arith.mulf %300, %539 : vector<8x128xf32>
    %541 = arith.addf %538, %540 : vector<8x128xf32>
    %542 = vector.broadcast %181 : vector<1x128xf32> to vector<8x128xf32>
    %543 = arith.mulf %309, %542 : vector<8x128xf32>
    %544 = arith.addf %541, %543 : vector<8x128xf32>
    %545 = vector.broadcast %183 : vector<1x128xf32> to vector<8x128xf32>
    %546 = arith.mulf %318, %545 : vector<8x128xf32>
    %547 = arith.addf %544, %546 : vector<8x128xf32>
    %548 = vector.broadcast %233 : vector<1x128xf32> to vector<8x128xf32>
    %549 = arith.addf %547, %548 : vector<8x128xf32>
    %cst_62 = arith.constant 0.000000e+00 : f32
    %550 = vector.broadcast %cst_62 : f32 to vector<8x128xf32>
    %551 = arith.maximumf %549, %550 : vector<8x128xf32>
    %c6_63 = arith.constant 6 : index
    %552 = memref.load %arg6[%c6_63] : memref<9xf32, #tpu.memory_space<smem>>
    %553 = vector.broadcast %552 : f32 to vector<8x128xf32>
    %554 = arith.mulf %551, %553 : vector<8x128xf32>
    %555 = arith.addf %521, %554 : vector<8x128xf32>
    %556 = vector.broadcast %185 : vector<1x128xf32> to vector<8x128xf32>
    %557 = arith.mulf %246, %556 : vector<8x128xf32>
    %558 = vector.broadcast %187 : vector<1x128xf32> to vector<8x128xf32>
    %559 = arith.mulf %255, %558 : vector<8x128xf32>
    %560 = arith.addf %557, %559 : vector<8x128xf32>
    %561 = vector.broadcast %189 : vector<1x128xf32> to vector<8x128xf32>
    %562 = arith.mulf %264, %561 : vector<8x128xf32>
    %563 = arith.addf %560, %562 : vector<8x128xf32>
    %564 = vector.broadcast %191 : vector<1x128xf32> to vector<8x128xf32>
    %565 = arith.mulf %273, %564 : vector<8x128xf32>
    %566 = arith.addf %563, %565 : vector<8x128xf32>
    %567 = vector.broadcast %193 : vector<1x128xf32> to vector<8x128xf32>
    %568 = arith.mulf %282, %567 : vector<8x128xf32>
    %569 = arith.addf %566, %568 : vector<8x128xf32>
    %570 = vector.broadcast %195 : vector<1x128xf32> to vector<8x128xf32>
    %571 = arith.mulf %291, %570 : vector<8x128xf32>
    %572 = arith.addf %569, %571 : vector<8x128xf32>
    %573 = vector.broadcast %197 : vector<1x128xf32> to vector<8x128xf32>
    %574 = arith.mulf %300, %573 : vector<8x128xf32>
    %575 = arith.addf %572, %574 : vector<8x128xf32>
    %576 = vector.broadcast %199 : vector<1x128xf32> to vector<8x128xf32>
    %577 = arith.mulf %309, %576 : vector<8x128xf32>
    %578 = arith.addf %575, %577 : vector<8x128xf32>
    %579 = vector.broadcast %201 : vector<1x128xf32> to vector<8x128xf32>
    %580 = arith.mulf %318, %579 : vector<8x128xf32>
    %581 = arith.addf %578, %580 : vector<8x128xf32>
    %582 = vector.broadcast %235 : vector<1x128xf32> to vector<8x128xf32>
    %583 = arith.addf %581, %582 : vector<8x128xf32>
    %cst_64 = arith.constant 0.000000e+00 : f32
    %584 = vector.broadcast %cst_64 : f32 to vector<8x128xf32>
    %585 = arith.maximumf %583, %584 : vector<8x128xf32>
    %c7_65 = arith.constant 7 : index
    %586 = memref.load %arg6[%c7_65] : memref<9xf32, #tpu.memory_space<smem>>
    %587 = vector.broadcast %586 : f32 to vector<8x128xf32>
    %588 = arith.mulf %585, %587 : vector<8x128xf32>
    %589 = arith.addf %555, %588 : vector<8x128xf32>
    %590 = vector.broadcast %203 : vector<1x128xf32> to vector<8x128xf32>
    %591 = arith.mulf %246, %590 : vector<8x128xf32>
    %592 = vector.broadcast %205 : vector<1x128xf32> to vector<8x128xf32>
    %593 = arith.mulf %255, %592 : vector<8x128xf32>
    %594 = arith.addf %591, %593 : vector<8x128xf32>
    %595 = vector.broadcast %207 : vector<1x128xf32> to vector<8x128xf32>
    %596 = arith.mulf %264, %595 : vector<8x128xf32>
    %597 = arith.addf %594, %596 : vector<8x128xf32>
    %598 = vector.broadcast %209 : vector<1x128xf32> to vector<8x128xf32>
    %599 = arith.mulf %273, %598 : vector<8x128xf32>
    %600 = arith.addf %597, %599 : vector<8x128xf32>
    %601 = vector.broadcast %211 : vector<1x128xf32> to vector<8x128xf32>
    %602 = arith.mulf %282, %601 : vector<8x128xf32>
    %603 = arith.addf %600, %602 : vector<8x128xf32>
    %604 = vector.broadcast %213 : vector<1x128xf32> to vector<8x128xf32>
    %605 = arith.mulf %291, %604 : vector<8x128xf32>
    %606 = arith.addf %603, %605 : vector<8x128xf32>
    %607 = vector.broadcast %215 : vector<1x128xf32> to vector<8x128xf32>
    %608 = arith.mulf %300, %607 : vector<8x128xf32>
    %609 = arith.addf %606, %608 : vector<8x128xf32>
    %610 = vector.broadcast %217 : vector<1x128xf32> to vector<8x128xf32>
    %611 = arith.mulf %309, %610 : vector<8x128xf32>
    %612 = arith.addf %609, %611 : vector<8x128xf32>
    %613 = vector.broadcast %219 : vector<1x128xf32> to vector<8x128xf32>
    %614 = arith.mulf %318, %613 : vector<8x128xf32>
    %615 = arith.addf %612, %614 : vector<8x128xf32>
    %616 = vector.broadcast %237 : vector<1x128xf32> to vector<8x128xf32>
    %617 = arith.addf %615, %616 : vector<8x128xf32>
    %cst_66 = arith.constant 0.000000e+00 : f32
    %618 = vector.broadcast %cst_66 : f32 to vector<8x128xf32>
    %619 = arith.maximumf %617, %618 : vector<8x128xf32>
    %c8_67 = arith.constant 8 : index
    %620 = memref.load %arg6[%c8_67] : memref<9xf32, #tpu.memory_space<smem>>
    %621 = vector.broadcast %620 : f32 to vector<8x128xf32>
    %622 = arith.mulf %619, %621 : vector<8x128xf32>
    %623 = arith.addf %589, %622 : vector<8x128xf32>
    %c0_68 = arith.constant 0 : index
    %624 = memref.load %arg7[%c0_68] : memref<1xf32, #tpu.memory_space<smem>>
    %625 = vector.broadcast %624 : f32 to vector<8x128xf32>
    %626 = arith.addf %623, %625 : vector<8x128xf32>
    %cst_69 = arith.constant 5.000000e-01 : f32
    %627 = vector.broadcast %cst_69 : f32 to vector<8x128xf32>
    %628 = arith.mulf %627, %626 : vector<8x128xf32>
    %629 = math.tanh %628 : vector<8x128xf32>
    %cst_70 = arith.constant 5.000000e-01 : f32
    %630 = vector.broadcast %cst_70 : f32 to vector<8x128xf32>
    %631 = arith.mulf %630, %629 : vector<8x128xf32>
    %cst_71 = arith.constant 5.000000e-01 : f32
    %632 = vector.broadcast %cst_71 : f32 to vector<8x128xf32>
    %633 = arith.addf %631, %632 : vector<8x128xf32>
    %c0_72 = arith.constant 0 : index
    %c0_73 = arith.constant 0 : index
    %634 = vector.load %arg8[%c0_72, %c0_73] : memref<8x128xf32, #tpu.memory_space<vmem>>, vector<8x128xf32>
    tpu.vector_store %arg8[%c0_72, %c0_73], %633 {strides = array<i32>} : memref<8x128xf32, #tpu.memory_space<vmem>>, vector<8x128xf32>,
    return
  }
  func.func @transform_0(%arg0: i32) -> (i32, i32, i32) {
    %c0_i32 = arith.constant 0 : i32
    %c0_i32_0 = arith.constant 0 : i32
    %c0_i32_1 = arith.constant 0 : i32
    return %c0_i32, %arg0, %c0_i32_0 : i32, i32, i32
  }
  func.func @transform_1(%arg0: i32) -> i32 {
    %c0_i32 = arith.constant 0 : i32
    %c0_i32_0 = arith.constant 0 : i32
    return %c0_i32 : i32
  }
  func.func @transform_2(%arg0: i32) -> i32 {
    %c0_i32 = arith.constant 0 : i32
    %c0_i32_0 = arith.constant 0 : i32
    return %c0_i32 : i32
  }
  func.func @transform_3(%arg0: i32) -> i32 {
    %c0_i32 = arith.constant 0 : i32
    %c0_i32_0 = arith.constant 0 : i32
    return %c0_i32 : i32
  }
  func.func @transform_4(%arg0: i32) -> i32 {
    %c0_i32 = arith.constant 0 : i32
    %c0_i32_0 = arith.constant 0 : i32
    return %c0_i32 : i32
  }
  func.func @transform_5(%arg0: i32) -> i32 {
    %c0_i32 = arith.constant 0 : i32
    %c0_i32_0 = arith.constant 0 : i32
    return %c0_i32 : i32
  }
  func.func @transform_6(%arg0: i32) -> i32 {
    %c0_i32 = arith.constant 0 : i32
    %c0_i32_0 = arith.constant 0 : i32
    return %c0_i32 : i32
  }
  func.func @transform_7(%arg0: i32) -> (i32, i32) {
    %c0_i32 = arith.constant 0 : i32
    %c0_i32_0 = arith.constant 0 : i32
    return %arg0, %c0_i32 : i32, i32
  }
}

</mosaic_0001>

<bundles_post_ra>
// kernel: discriminator_forward.1
= control target key start
LH: loop header
LB: loop body
LE: loop exit
PB: predicated region body
PF: predicated region fallthrough
CT: control target
= control target key end

     0   :  { %s1352_s0 = inlined_call_operand.vmem [shape: f32[2,8,128], index: 0, kind: input, shape index: {}]   ;;  %s1353_s1 = inlined_call_operand.vmem [shape: f32[18], index: 1, kind: input, shape index: {}]   ;;  %s1354_s2 = inlined_call_operand.vmem [shape: f32[9], index: 2, kind: input, shape index: {}]   ;;  %s1355_s3 = inlined_call_operand.vmem [shape: f32[81], index: 3, kind: input, shape index: {}]   ;;  %s1356_s4 = inlined_call_operand.vmem [shape: f32[9], index: 4, kind: input, shape index: {}]   ;;  %s1357_s5 = inlined_call_operand.vmem [shape: f32[9], index: 5, kind: input, shape index: {}]   ;;  %s1358_s6 = inlined_call_operand.<no memory space> [shape: f32[1], index: 6, kind: input, shape index: {}]   ;;  %s1359_s7 = inlined_call_operand.vmem [shape: f32[8,128], index: 7, kind: output, shape index: {}]  }
   0x1   :  { %1360 = sst [smem:[#allocation32_spill]] %s1358_s6 }
   0x2   :  { %1361 = sst [smem:[#allocation33_spill]] %s1359_s7 }
   0x3   :  { %13 = vsyncpa [#allocation4], 0 }
   0x4   :  { %14 = vsyncpa [#allocation6], 0  ;;  %s32_s26 = sshll.u32 %s1354_s2, 4  ;;  %s33_s26 = int_to_ptr.vmem [resolvable:$true] %s32_s26 }
   0x5   :  { %15 = vsyncpa [#allocation9], 0  ;;  %s50_s29 = sshll.u32 %s1356_s4, 4  ;;  %s784_s30 = smov [#allocation5]   ;;  %s51_s29 = int_to_ptr.vmem [resolvable:$true] %s50_s29 }
   0x6   :  { %35 = dma.vmem_to_smem %s33_s26, 16, %s784_s30, [#allocation6]  }
   0x7   :  { %s785_s8 = smov [#allocation8]   ;;  %s23_s11 = sshll.u32 %s1353_s1, 4  ;;  %s24_s11 = int_to_ptr.vmem [resolvable:$true] %s23_s11 }
   0x8   :  { %53 = dma.vmem_to_smem %s51_s29, 16, %s785_s8, [#allocation9]  }
   0x9   :  { %s41_s2 = sshll.u32 %s1355_s3, 4  ;;  %s786_s14 = smov [#allocation3]   ;;  %s42_s2 = int_to_ptr.vmem [resolvable:$true] %s41_s2 }
   0xa   :  { %26 = dma.vmem_to_smem %s24_s11, 16, %s786_s14, [#allocation4]  }
   0xb   :  { %s787_s15 = smov [#allocation7]   ;;  %s59_s17 = sshll.u32 %s1357_s5, 4  ;;  %s60_s17 = int_to_ptr.vmem [resolvable:$true] %s59_s17 }
   0xc   :  { %44 = dma.vmem_to_smem %s42_s2, 16, %s787_s15, [#allocation6]  }
   0xd   :  { %s788_s18 = smov [#allocation10]  }
   0xe   :  { %62 = dma.vmem_to_smem %s60_s17, 16, %s788_s18, [#allocation9]  }
   0xf   :  { %778 = dma.done.wait [#allocation4], 16  }
  0x10   :  { %779 = vsyncadd [#allocation4], 4294967280 }
  0x11   :  { %780 = dma.done.wait [#allocation6], 32  }
  0x12   :  { %781 = vsyncadd [#allocation6], 4294967264 }
  0x13   :  { %782 = dma.done.wait [#allocation9], 32  }
  0x14   :  { %783 = vsyncadd [#allocation9], 4294967264 }
  0x15   :  { %85 = sfence }
  0x16   :  { %s844_s1 = sld [smem:[#allocation3]]  ;;  %v929_v0 = vld [vmem:[%s1352_s0] sm:$0xff]  ;;  %v934_v1 = vld [vmem:[%s1352_s0 + $0x8] sm:$0xff] }
  0x17   :  { %s846_s3 = sld [smem:[#allocation3 + $0x1]] }
  0x18   :  { %s848_s19 = sld [smem:[#allocation3 + $0x2]] }
  0x19   :  { %s850_s20 = sld [smem:[#allocation3 + $0x3]] }
  0x1a   :  { %s852_s21 = sld [smem:[#allocation3 + $0x4]] }
  0x1b   :  { %s854_s5 = sld [smem:[#allocation3 + $0x5]] }
  0x1c   :  { %s856_s22 = sld [smem:[#allocation3 + $0x6]]  ;;  %v206_v2 = vstv %s844_s1 }
  0x1d   :  { %s858_s23 = sld [smem:[#allocation3 + $0x7]]  ;;  %v208_v3 = vstv %s846_s3  ;;  %v207_v6 = vmul.f32 %v206_v2, %v929_v0 }
  0x1e   :  { %s860_s24 = sld [smem:[#allocation3 + $0x8]]  ;;  %v214_v4 = vstv %s848_s19  ;;  %v209_v7 = vmul.f32 %v934_v1, %v208_v3 }
  0x1f   :  { %s862_s25 = sld [smem:[#allocation3 + $0x9]]  ;;  %v216_v5 = vstv %s850_s20  ;;  %v215_v8 = vmul.f32 %v214_v4, %v929_v0 }
  0x20   :  { %s864_s26 = sld [smem:[#allocation3 + $0xa]]  ;;  %v217_v9 = vmul.f32 %v934_v1, %v216_v5  ;;  %v222_v10 = vstv %s852_s21  ;;  %v210_v12 = vadd.f32 %v209_v7, %v207_v6 }
  0x21   :  { %s866_s27 = sld [smem:[#allocation3 + $0xb]]  ;;  %v224_v11 = vstv %s854_s5  ;;  %v223_v14 = vmul.f32 %v222_v10, %v929_v0 }
  0x22   :  { %s868_s28 = sld [smem:[#allocation3 + $0xc]]  ;;  %v218_v13 = vadd.f32 %v217_v9, %v215_v8  ;;  %v225_v15 = vmul.f32 %v934_v1, %v224_v11  ;;  %v230_v18 = vstv %s856_s22 }
  0x23   :  { %s870_s29 = sld [smem:[#allocation3 + $0xd]]  ;;  %v232_v19 = vstv %s858_s23  ;;  %v231_v22 = vmul.f32 %v230_v18, %v929_v0 }
  0x24   :  { %s872_s30 = sld [smem:[#allocation3 + $0xe]]  ;;  %v226_v21 = vadd.f32 %v225_v15, %v223_v14  ;;  %v233_v24 = vmul.f32 %v934_v1, %v232_v19  ;;  %v238_v25 = vstv %s860_s24 }
  0x25   :  { %s874_s8 = sld [smem:[#allocation3 + $0xf]]  ;;  %v240_v26 = vstv %s862_s25  ;;  %v239_v30 = vmul.f32 %v238_v25, %v929_v0 }
  0x26   :  { %s876_s9 = sld [smem:[#allocation3 + $0x10]]  ;;  %v234_v31 = vadd.f32 %v233_v24, %v231_v22  ;;  %v241_v33 = vmul.f32 %v934_v1, %v240_v26  ;;  %v246_v34 = vstv %s864_s26 }
  0x27   :  { %s878_s10 = sld [smem:[#allocation3 + $0x11]]  ;;  %v247_v35 = vmul.f32 %v246_v34, %v929_v0  ;;  %v248_v36 = vstv %s866_s27 }
  0x28   :  { %s880_s11 = sld [smem:[#allocation5]]  ;;  %v242_v39 = vadd.f32 %v241_v33, %v239_v30  ;;  %v249_v41 = vmul.f32 %v934_v1, %v248_v36  ;;  %v254_v44 = vstv %s868_s28 }
  0x29   :  { %s882_s12 = sld [smem:[#allocation5 + $0x1]]  ;;  %v256_v45 = vstv %s870_s29  ;;  %v255_v50 = vmul.f32 %v254_v44, %v929_v0 }
  0x2a   :  { %1362 = sst [smem:[#allocation14_spill]] %s872_s30  ;;  %v250_v47 = vadd.f32 %v249_v41, %v247_v35  ;;  %v257_v51 = vmul.f32 %v934_v1, %v256_v45 }
  0x2b   :  { %1363 = sst [smem:[#allocation15_spill]] %s874_s8 }
  0x2c   :  { %1364 = sst [smem:[#allocation16_spill]] %s876_s9  ;;  %v258_v58 = vadd.f32 %v257_v51, %v255_v50 }
  0x2d   :  { %1365 = sst [smem:[#allocation17_spill]] %s878_s10 }
  0x2e   :  { %s884_s13 = sld [smem:[#allocation5 + $0x2]]  ;;  %v211_v16 = vstv %s880_s11 }
  0x2f   :  { %s886_s2 = sld [smem:[#allocation5 + $0x3]]  ;;  %v219_v17 = vstv %s882_s12  ;;  %v212_v20 = vadd.f32 %v211_v16, %v210_v12 }
  0x30   :  { %s888_s14 = sld [smem:[#allocation5 + $0x4]]  ;;  %v220_v28 = vadd.f32 %v219_v17, %v218_v13 }
  0x31   :  { %s890_s15 = sld [smem:[#allocation5 + $0x5]]  ;;  %v977_v27 = vmax.f32 %v212_v20, 0.0 }
  0x32   :  { %s892_s4 = sld [smem:[#allocation5 + $0x6]]  ;;  %v996_v42 = vmax.f32 %v220_v28, 0.0 }
  0x33   :  { %s894_s16 = sld [smem:[#allocation5 + $0x7]] }
  0x34   :  { %s896_s17 = sld [smem:[#allocation5 + $0x8]]  ;;  %v227_v23 = vstv %s884_s13 }
  0x35   :  { %s898_s18 = sld [smem:[#allocation7]]  ;;  %v228_v29 = vadd.f32 %v227_v23, %v226_v21  ;;  %v235_v32 = vstv %s886_s2 }
  0x36   :  { %s900_s7 = sld [smem:[#allocation7 + $0x1]]  ;;  %v236_v38 = vadd.f32 %v235_v32, %v234_v31  ;;  %v243_v40 = vstv %s888_s14 }
  0x37   :  { %1366 = sst [smem:[#allocation18_spill]] %s890_s15  ;;  %v998_v43 = vmax.f32 %v228_v29, 0.0  ;;  %v244_v46 = vadd.f32 %v243_v40, %v242_v39 }
  0x38   :  { %1367 = sst [smem:[#allocation19_spill]] %s892_s4  ;;  %v1014_v54 = vmax.f32 %v236_v38, 0.0 }
  0x39   :  { %1368 = sst [smem:[#allocation20_spill]] %s894_s16  ;;  %v1030_v3 = vmax.f32 %v244_v46, 0.0 }
  0x3a   :  { %1369 = sst [smem:[#allocation21_spill]] %s896_s17 }
  0x3b   :  { %s902_s6 = sld [smem:[#allocation7 + $0x2]]  ;;  %v278_v37 = vstv %s898_s18 }
  0x3c   :  { %1370 = sst [smem:[#allocation22_spill]] %s900_s7  ;;  %v279_v49 = vmul.f32 %v278_v37, %v977_v27 }
  0x3d   :  { %s904_s10 = sld [smem:[#allocation7 + $0x3]] }
  0x3e   :  { %s906_s9 = sld [smem:[#allocation7 + $0x4]] }
  0x3f   :  { %s908_s8 = sld [smem:[#allocation7 + $0x5]] }
  0x40   :  { %s910_s4 = sld [smem:[#allocation7 + $0x6]] }
  0x41   :  { %1371 = sst [smem:[#allocation23_spill]] %s902_s6 }
  0x42   :  { %s912_s16 = sld [smem:[#allocation7 + $0x7]] }
  0x43   :  { %1372 = sst [smem:[#allocation24_spill]] %s904_s10 }
  0x44   :  { %1373 = sst [smem:[#allocation25_spill]] %s906_s9 }
  0x45   :  { %1374 = sst [smem:[#allocation26_spill]] %s908_s8 }
  0x46   :  { %1375 = sst [smem:[#allocation27_spill]] %s910_s4 }
  0x47   :  { %s914_s17 = sld [smem:[#allocation7 + $0x8]] }
  0x48   :  { %1376 = sst [smem:[#allocation28_spill]] %s912_s16 }
  0x49   :  { %s916_s30 = sld [smem:[#allocation7 + $0x9]] }
  0x4a   :  { %s918_s7 = sld [smem:[#allocation7 + $0xa]] }
  0x4b   :  { %s920_s6 = sld [smem:[#allocation7 + $0xb]] }
  0x4c   :  { %s922_s10 = sld [smem:[#allocation7 + $0xc]] }
  0x4d   :  { %1377 = sst [smem:[#allocation29_spill]] %s914_s17 }
  0x4e   :  { %s924_s9 = sld [smem:[#allocation7 + $0xd]] }
  0x4f   :  { %s936_s17 = sld [smem:[#allocation7 + $0xe]]  ;;  %v310_v23 = vstv %s916_s30 }
  0x50   :  { %1378 = sst [smem:[#allocation30_spill]] %s918_s7  ;;  %v311_v26 = vmul.f32 %v310_v23, %v977_v27 }
  0x51   :  { %1379 = sst [smem:[#allocation31_spill]] %s920_s6 }
  0x52   :  { %s938_s7 = sld [smem:[#allocation7 + $0xf]]  ;;  %v318_v32 = vstv %s922_s10 }
  0x53   :  { %s940_s6 = sld [smem:[#allocation7 + $0x10]]  ;;  %v319_v35 = vmul.f32 %v318_v32, %v1014_v54 }
  0x54   :  { %s946_s8 = sld [smem:[#allocation7 + $0x11]]  ;;  %v321_v33 = vstv %s924_s9 }
  0x55   :  { %s952_s0 = sld [smem:[#allocation7 + $0x12]]  ;;  %v324_v36 = vstv %s936_s17  ;;  %v322_v46 = vmul.f32 %v321_v33, %v1030_v3 }
  0x56   :  { %s956_s1 = sld [smem:[#allocation7 + $0x13]] }
  0x57   :  { %s960_s3 = sld [smem:[#allocation7 + $0x14]] }
  0x58   :  { %s966_s19 = sld [smem:[#allocation7 + $0x15]] }
  0x59   :  { %s969_s20 = sld [smem:[#allocation7 + $0x16]] }
  0x5a   :  { %s975_s21 = sld [smem:[#allocation7 + $0x17]] }
  0x5b   :  { %s980_s5 = sld [smem:[#allocation7 + $0x18]] }
  0x5c   :  { %s985_s22 = sld [smem:[#allocation7 + $0x19]]  ;;  %v345_v50 = vstv %s956_s1 }
  0x5d   :  { %s1380_s23 = sld [smem:[#allocation18_spill]] }
  0x5e   :  { %s990_s24 = sld [smem:[#allocation7 + $0x1a]] }
  0x5f   :  { %s1382_s25 = sld [smem:[#allocation14_spill]] }
  0x60   :  { %s1383_s11 = sld [smem:[#allocation15_spill]] }
  0x61   :  { %s994_s12 = sld [smem:[#allocation7 + $0x1b]] }
  0x62   :  { %s1384_s26 = sld [smem:[#allocation19_spill]] }
  0x63   :  { %s1385_s13 = sld [smem:[#allocation22_spill]]  ;;  %v251_v48 = vstv %s1380_s23 }
  0x64   :  { %1381 = sst [smem:[#allocation18_spill]] %s990_s24  ;;  %v252_v62 = vadd.f32 %v251_v48, %v250_v47  ;;  %v327_v48 = vstv %s938_s7 }
  0x65   :  { %s1002_s27 = sld [smem:[#allocation7 + $0x1c]]  ;;  %v262_v52 = vstv %s1382_s25 }
  0x66   :  { %s1386_s2 = sld [smem:[#allocation16_spill]]  ;;  %v264_v53 = vstv %s1383_s11  ;;  %v263_v56 = vmul.f32 %v262_v52, %v929_v0  ;;  %v1045_v13 = vmax.f32 %v252_v62, 0.0 }
  0x67   :  { %s1387_s14 = sld [smem:[#allocation17_spill]]  ;;  %v265_v59 = vmul.f32 %v934_v1, %v264_v53  ;;  %v346_v53 = vmul.f32 %v345_v50, %v996_v42 }
  0x68   :  { %s1006_s15 = sld [smem:[#allocation7 + $0x1d]]  ;;  %v259_v55 = vstv %s1384_s26  ;;  %v325_v47 = vmul.f32 %v324_v36, %v1045_v13 }
  0x69   :  { %s1012_s28 = sld [smem:[#allocation7 + $0x1e]]  ;;  %v280_v57 = vstv %s1385_s13  ;;  %v260_v4 = vadd.f32 %v259_v55, %v258_v58  ;;  %v266_v7 = vadd.f32 %v265_v59, %v263_v56  ;;  %v348_v55 = vstv %s960_s3 }
  0x6a   :  { %s1388_s29 = sld [smem:[#allocation23_spill]]  ;;  %v281_v5 = vmul.f32 %v280_v57, %v996_v42  ;;  %v330_v56 = vstv %s940_s6  ;;  %v349_v57 = vmul.f32 %v348_v55, %v998_v43  ;;  %v351_v58 = vstv %s966_s19 }
  0x6b   :  { %s1019_s4 = sld [smem:[#allocation7 + $0x1f]]  ;;  %v1054_v18 = vmax.f32 %v260_v4, 0.0  ;;  %v354_v59 = vstv %s969_s20 }
  0x6c   :  { %s1389_s16 = sld [smem:[#allocation24_spill]]  ;;  %v270_v60 = vstv %s1386_s2  ;;  %v282_v11 = vadd.f32 %v281_v5, %v279_v49  ;;  %v343_v49 = vstv %s952_s0 }
  0x6d   :  { %v272_v61 = vstv %s1387_s14  ;;  %s1390_s18 = sld [smem:[#allocation20_spill]]  ;;  %v271_v63 = vmul.f32 %v270_v60, %v929_v0  ;;  %v344_v52 = vmul.f32 %v343_v49, %v977_v27  ;;  %v328_v5 = vmul.f32 %v327_v48, %v1054_v18 }
  0x6e   :  { %s1024_s23 = sld [smem:[#allocation7 + $0x20]]  ;;  %v273_v2 = vmul.f32 %v934_v1, %v272_v61  ;;  %v333_v61 = vstv %s946_s8 }
  0x6f   :  { %s1392_s25 = sld [smem:[#allocation21_spill]]  ;;  %v347_v62 = vadd.f32 %v346_v53, %v344_v52 }
  0x70   :  { %s1028_s11 = sld [smem:[#allocation7 + $0x21]]  ;;  %v283_v6 = vstv %s1388_s29  ;;  %v274_v8 = vadd.f32 %v273_v2, %v271_v63  ;;  %v352_v63 = vmul.f32 %v351_v58, %v1014_v54 }
  0x71   :  { %s1394_s26 = sld [smem:[#allocation25_spill]]  ;;  %v284_v9 = vmul.f32 %v283_v6, %v998_v43  ;;  %v357_v6 = vstv %s975_s21 }
  0x72   :  { %s1034_s13 = sld [smem:[#allocation7 + $0x22]]  ;;  %v286_v10 = vstv %s1389_s16 }
  0x73   :  { %s1395_s2 = sld [smem:[#allocation26_spill]]  ;;  %v267_v0 = vstv %s1390_s18  ;;  %v287_v12 = vmul.f32 %v286_v10, %v1014_v54  ;;  %v285_v15 = vadd.f32 %v284_v9, %v282_v11  ;;  %v350_v9 = vadd.f32 %v349_v57, %v347_v62 }
  0x74   :  { %1391 = sst [smem:[#allocation14_spill]] %s1024_s23  ;;  %v268_v19 = vadd.f32 %v267_v0, %v266_v7  ;;  %v355_v10 = vmul.f32 %v354_v59, %v1030_v3  ;;  %v376_v11 = vstv %s994_s12 }
  0x75   :  { %s1038_s14 = sld [smem:[#allocation7 + $0x23]]  ;;  %v275_v1 = vstv %s1392_s25  ;;  %v288_v21 = vadd.f32 %v287_v12, %v285_v15  ;;  %v378_v12 = vstv %s1002_s27  ;;  %v353_v15 = vadd.f32 %v352_v63, %v350_v9 }
  0x76   :  { %1393 = sst [smem:[#allocation15_spill]] %s1028_s11  ;;  %v276_v20 = vadd.f32 %v275_v1, %v274_v8  ;;  %v1078_v37 = vmax.f32 %v268_v19, 0.0  ;;  %v360_v1 = vstv %s980_s5  ;;  %v363_v19 = vstv %s985_s22 }
  0x77   :  { %s1397_s11 = sld [smem:[#allocation27_spill]]  ;;  %v289_v14 = vstv %s1394_s26  ;;  %v356_v23 = vadd.f32 %v355_v10, %v353_v15 }
  0x78   :  { %s1398_s24 = sld [smem:[#allocation30_spill]]  ;;  %v290_v16 = vmul.f32 %v289_v14, %v1030_v3  ;;  %v1080_v38 = vmax.f32 %v276_v20, 0.0  ;;  %v331_v8 = vmul.f32 %v330_v56, %v1078_v37  ;;  %v379_v20 = vmul.f32 %v378_v12, %v996_v42 }
  0x79   :  { %s1043_s23 = sld [smem:[#allocation7 + $0x24]]  ;;  %v292_v17 = vstv %s1395_s2 }
  0x7a   :  { %s1048_s29 = sld [smem:[#allocation7 + $0x25]]  ;;  %v293_v25 = vmul.f32 %v292_v17, %v1045_v13  ;;  %v291_v30 = vadd.f32 %v290_v16, %v288_v21  ;;  %v1124_v0 = vmul.f32 %v333_v61, %v1080_v38  ;;  %v358_v16 = vmul.f32 %v357_v6, %v1045_v13 }
  0x7b   :  { %1396 = sst [smem:[#allocation19_spill]] %s1038_s14  ;;  %v377_v17 = vmul.f32 %v376_v11, %v977_v27  ;;  %v381_v21 = vstv %s1006_s15 }
  0x7c   :  { %s1399_s16 = sld [smem:[#allocation31_spill]]  ;;  %v294_v41 = vadd.f32 %v293_v25, %v291_v30  ;;  %v382_v25 = vmul.f32 %v381_v21, %v998_v43  ;;  %v359_v33 = vadd.f32 %v358_v16, %v356_v23 }
  0x7d   :  { %s1052_s18 = sld [smem:[#allocation7 + $0x26]]  ;;  %v295_v22 = vstv %s1397_s11 }
  0x7e   :  { %s1056_s25 = sld [smem:[#allocation7 + $0x27]]  ;;  %v312_v24 = vstv %s1398_s24  ;;  %v296_v39 = vmul.f32 %v295_v22, %v1054_v18  ;;  %v384_v22 = vstv %s1012_s28 }
  0x7f   :  { %s1061_s26 = sld [smem:[#allocation7 + $0x28]]  ;;  %v313_v28 = vmul.f32 %v312_v24, %v996_v42  ;;  %v361_v24 = vmul.f32 %v360_v1, %v1054_v18  ;;  %v385_v30 = vmul.f32 %v384_v22, %v1014_v54 }
  0x80   :  { %s1401_s2 = sld [smem:[#allocation28_spill]]  ;;  %v297_v7 = vadd.f32 %v296_v39, %v294_v41  ;;  %v409_v41 = vstv %s1043_s23  ;;  %v411_v49 = vstv %s1048_s29 }
  0x81   :  { %s1067_s14 = sld [smem:[#allocation7 + $0x29]]  ;;  %v314_v34 = vadd.f32 %v313_v28, %v311_v26  ;;  %v387_v26 = vstv %s1019_s4  ;;  %v412_v55 = vmul.f32 %v411_v49, %v996_v42 }
  0x82   :  { %v315_v29 = vstv %s1399_s16  ;;  %s1072_s30 = sld [smem:[#allocation7 + $0x2a]]  ;;  %v388_v39 = vmul.f32 %v387_v26, %v1030_v3 }
  0x83   :  { %1400 = sst [smem:[#allocation22_spill]] %s1052_s18  ;;  %v316_v31 = vmul.f32 %v315_v29, %v998_v43  ;;  %v380_v29 = vadd.f32 %v379_v20, %v377_v17 }
  0x84   :  { %s1402_s18 = sld [smem:[#allocation29_spill]] }
  0x85   :  { %s1076_s24 = sld [smem:[#allocation7 + $0x2b]]  ;;  %v317_v45 = vadd.f32 %v316_v31, %v314_v34  ;;  %v364_v34 = vmul.f32 %v363_v19, %v1078_v37  ;;  %v383_v36 = vadd.f32 %v382_v25, %v380_v29  ;;  %v420_v59 = vstv %s1061_s26 }
  0x86   :  { %v298_v40 = vstv %s1401_s2  ;;  %s1084_s9 = sld [smem:[#allocation7 + $0x2c]] }
  0x87   :  { %s1088_s10 = sld [smem:[#allocation7 + $0x2d]]  ;;  %v320_v51 = vadd.f32 %v319_v35, %v317_v45  ;;  %v299_v2 = vmul.f32 %v298_v40, %v1078_v37  ;;  %v386_v48 = vadd.f32 %v385_v30, %v383_v36 }
  0x88   :  { %s1094_s17 = sld [smem:[#allocation7 + $0x2e]] }
  0x89   :  { %s1099_s11 = sld [smem:[#allocation7 + $0x2f]]  ;;  %v323_v60 = vadd.f32 %v322_v46, %v320_v51  ;;  %v300_v28 = vadd.f32 %v299_v2, %v297_v7  ;;  %v396_v46 = vstv %s1034_s13  ;;  %v417_v51 = vstv %s1056_s25 }
  0x8a   :  { %v301_v44 = vstv %s1402_s18  ;;  %s1105_s16 = sld [smem:[#allocation7 + $0x30]]  ;;  %v389_v57 = vadd.f32 %v388_v39, %v386_v48  ;;  %v397_v61 = vmul.f32 %v396_v46, %v1078_v37  ;;  %v418_v2 = vmul.f32 %v417_v51, %v1014_v54 }
  0x8b   :  { %s1109_s7 = sld [smem:[#allocation7 + $0x31]]  ;;  %v1113_v4 = vmul.f32 %v301_v44, %v1080_v38  ;;  %v326_v14 = vadd.f32 %v325_v47, %v323_v60  ;;  %v362_v44 = vadd.f32 %v361_v24, %v359_v33  ;;  %v410_v47 = vmul.f32 %v409_v41, %v977_v27 }
  0x8c   :  { %s1117_s6 = sld [smem:[#allocation7 + $0x32]]  ;;  %v423_v60 = vstv %s1067_s14  ;;  %v421_v7 = vmul.f32 %v420_v59, %v1030_v3  ;;  %v429_v1 = vstv %s1076_s24 }
  0x8d   :  { %s1121_s8 = sld [smem:[#allocation7 + $0x33]]  ;;  %v329_v32 = vadd.f32 %v328_v5, %v326_v14  ;;  %v413_v63 = vadd.f32 %v412_v55, %v410_v47  ;;  %v365_v5 = vadd.f32 %v364_v34, %v362_v44  ;;  %v424_v10 = vmul.f32 %v423_v60, %v1045_v13 }
  0x8e   :  { %s1129_s0 = sld [smem:[#allocation7 + $0x34]]  ;;  %v442_v11 = vstv %s1088_s10  ;;  %v444_v15 = vstv %s1094_s17  ;;  %v303_v22 = vadd.f32 %v1113_v4, %v300_v28  ;;  %v430_v28 = vmul.f32 %v429_v1, %v1078_v37 }
  0x8f   :  { %s1403_s1 = sld [smem:[#allocation14_spill]]  ;;  %v332_v52 = vadd.f32 %v331_v8, %v329_v32  ;;  %v426_v8 = vstv %s1072_s30  ;;  %v443_v14 = vmul.f32 %v442_v11, %v977_v27  ;;  %v447_v16 = vstv %s1099_s11 }
  0x90   :  { %s1133_s3 = sld [smem:[#allocation7 + $0x35]]  ;;  %v445_v19 = vmul.f32 %v444_v15, %v996_v42  ;;  %v448_v20 = vmul.f32 %v447_v16, %v998_v43  ;;  %v450_v21 = vstv %s1105_s16  ;;  %v427_v29 = vmul.f32 %v426_v8, %v1054_v18 }
  0x91   :  { %s1404_s19 = sld [smem:[#allocation18_spill]]  ;;  %v335_v23 = vadd.f32 %v1124_v0, %v332_v52  ;;  %v453_v25 = vstv %s1109_s7  ;;  %v432_v32 = vstv %s1084_s9 }
  0x92   :  { %s1139_s20 = sld [smem:[#allocation7 + $0x36]]  ;;  %v446_v30 = vadd.f32 %v445_v19, %v443_v14  ;;  %v456_v36 = vstv %s1117_s6  ;;  %v433_v49 = vmul.f32 %v432_v32, %v1080_v38 }
  0x93   :  { %s1405_s21 = sld [smem:[#allocation15_spill]]  ;;  %v459_v39 = vstv %s1121_s8 }
  0x94   :  { %s1144_s5 = sld [smem:[#allocation7 + $0x37]]  ;;  %v449_v34 = vadd.f32 %v448_v20, %v446_v30  ;;  %v462_v51 = vstv %s1129_s0 }
  0x95   :  { %v390_v31 = vstv %s1403_s1  ;;  %s1148_s22 = sld [smem:[#allocation7 + $0x38]] }
  0x96   :  { %s1406_s12 = sld [smem:[#allocation22_spill]]  ;;  %v391_v45 = vmul.f32 %v390_v31, %v1045_v13  ;;  %v451_v31 = vmul.f32 %v450_v21, %v1014_v54  ;;  %v465_v8 = vstv %s1133_s3 }
  0x97   :  { %v366_v35 = vstv %s1404_s19  ;;  %s1152_s27 = sld [smem:[#allocation7 + $0x39]] }
  0x98   :  { %s1157_s15 = sld [smem:[#allocation7 + $0x3a]]  ;;  %v367_v53 = vmul.f32 %v366_v35, %v1080_v38  ;;  %v392_v6 = vadd.f32 %v391_v45, %v389_v57  ;;  %v454_v35 = vmul.f32 %v453_v25, %v1030_v3  ;;  %v452_v46 = vadd.f32 %v451_v31, %v449_v34 }
  0x99   :  { %v393_v40 = vstv %s1405_s21  ;;  %s1162_s28 = sld [smem:[#allocation7 + $0x3b]] }
  0x9a   :  { %s1407_s4 = sld [smem:[#allocation19_spill]]  ;;  %v394_v58 = vmul.f32 %v393_v40, %v1054_v18  ;;  %v368_v4 = vadd.f32 %v367_v53, %v365_v5  ;;  %v475_v40 = vstv %s1139_s20  ;;  %v477_v41 = vstv %s1144_s5 }
  0x9b   :  { %s1167_s18 = sld [smem:[#allocation7 + $0x3c]]  ;;  %v480_v44 = vstv %s1148_s22  ;;  %v476_v47 = vmul.f32 %v475_v40, %v977_v27  ;;  %v478_v48 = vmul.f32 %v477_v41, %v996_v42  ;;  %v455_v55 = vadd.f32 %v454_v35, %v452_v46 }
  0x9c   :  { %v414_v50 = vstv %s1406_s12  ;;  %s1172_s23 = sld [smem:[#allocation7 + $0x3d]]  ;;  %v395_v12 = vadd.f32 %v394_v58, %v392_v6  ;;  %v481_v57 = vmul.f32 %v480_v44, %v998_v43 }
  0x9d   :  { %v415_v56 = vmul.f32 %v414_v50, %v998_v43  ;;  %s1177_s13 = sld [smem:[#allocation7 + $0x3e]]  ;;  %v457_v50 = vmul.f32 %v456_v36, %v1045_v13  ;;  %v483_v52 = vstv %s1152_s27 }
  0x9e   :  { %s1182_s29 = sld [smem:[#allocation7 + $0x3f]]  ;;  %v398_v0 = vadd.f32 %v397_v61, %v395_v12  ;;  %v479_v61 = vadd.f32 %v478_v48, %v476_v47 }
  0x9f   :  { %s1186_s25 = sld [smem:[#allocation7 + $0x40]]  ;;  %v416_v9 = vadd.f32 %v415_v56, %v413_v63  ;;  %v460_v56 = vmul.f32 %v459_v39, %v1054_v18  ;;  %v484_v63 = vmul.f32 %v483_v52, %v1014_v54  ;;  %v458_v6 = vadd.f32 %v457_v50, %v455_v55 }
  0xa0   :  { %v399_v62 = vstv %s1407_s4  ;;  %s1191_s14 = sld [smem:[#allocation7 + $0x41]]  ;;  %v482_v11 = vadd.f32 %v481_v57, %v479_v61  ;;  %v489_v16 = vstv %s1162_s28 }
  0xa1   :  { %s1196_s26 = sld [smem:[#allocation7 + $0x42]]  ;;  %v419_v17 = vadd.f32 %v418_v2, %v416_v9  ;;  %v400_v24 = vmul.f32 %v399_v62, %v1080_v38  ;;  %v486_v2 = vstv %s1157_s15  ;;  %v461_v14 = vadd.f32 %v460_v56, %v458_v6 }
  0xa2   :  { %s1201_s2 = sld [smem:[#allocation8]]  ;;  %v487_v15 = vmul.f32 %v486_v2, %v1030_v3  ;;  %v485_v19 = vadd.f32 %v484_v63, %v482_v11  ;;  %v490_v20 = vmul.f32 %v489_v16, %v1045_v13  ;;  %v492_v21 = vstv %s1167_s18 }
  0xa3   :  { %s1207_s30 = sld [smem:[#allocation8 + $0x1]]  ;;  %v422_v26 = vadd.f32 %v421_v7, %v419_v17  ;;  %v401_v62 = vadd.f32 %v400_v24, %v398_v0  ;;  %v463_v7 = vmul.f32 %v462_v51, %v1078_v37  ;;  %v493_v0 = vmul.f32 %v492_v21, %v1054_v18 }
  0xa4   :  { %s1211_s24 = sld [smem:[#allocation8 + $0x2]]  ;;  %v508_v34 = vstv %s1182_s29  ;;  %v498_v52 = vstv %s1177_s13 }
  0xa5   :  { %s1215_s10 = sld [smem:[#allocation8 + $0x3]]  ;;  %v425_v33 = vadd.f32 %v424_v10, %v422_v26  ;;  %v499_v2 = vmul.f32 %v498_v52, %v1080_v38 }
  0xa6   :  { %s1219_s17 = sld [smem:[#allocation7 + $0x43]]  ;;  %v513_v56 = vstv %s1191_s14 }
  0xa7   :  { %s1225_s11 = sld [smem:[#allocation8 + $0x4]]  ;;  %v428_v45 = vadd.f32 %v427_v29, %v425_v33  ;;  %v488_v29 = vadd.f32 %v487_v15, %v485_v19  ;;  %v495_v33 = vstv %s1172_s23  ;;  %v516_v57 = vstv %s1196_s26 }
  0xa8   :  { %s1229_s9 = sld [smem:[#allocation7 + $0x44]]  ;;  %v304_v53 = vstv %s1201_s2  ;;  %v496_v48 = vmul.f32 %v495_v33, %v1078_v37 }
  0xa9   :  { %s1235_s16 = sld [smem:[#allocation7 + $0x45]]  ;;  %v336_v58 = vstv %s1207_s30  ;;  %v431_v60 = vadd.f32 %v430_v28, %v428_v45  ;;  %v305_v5 = vadd.f32 %v304_v53, %v303_v22  ;;  %v464_v22 = vadd.f32 %v463_v7, %v461_v14 }
  0xaa   :  { %s1240_s7 = sld [smem:[#allocation8 + $0x5]]  ;;  %v369_v59 = vstv %s1211_s24  ;;  %v337_v9 = vadd.f32 %v336_v58, %v335_v23  ;;  %v466_v23 = vmul.f32 %v465_v8, %v1080_v38  ;;  %v491_v32 = vadd.f32 %v490_v20, %v488_v29 }
  0xab   :  { %s1244_s6 = sld [smem:[#allocation10]]  ;;  %v370_v10 = vadd.f32 %v369_v59, %v368_v4  ;;  %v402_v1 = vstv %s1215_s10  ;;  %v434_v12 = vadd.f32 %v433_v49, %v431_v60  ;;  %v306_v24 = vmax.f32 %v305_v5, 0.0 }
  0xac   :  { %s1248_s8 = sld [smem:[#allocation10 + $0x1]]  ;;  %v338_v25 = vmax.f32 %v337_v9, 0.0  ;;  %v403_v26 = vadd.f32 %v402_v1, %v401_v62  ;;  %v467_v36 = vadd.f32 %v466_v23, %v464_v22  ;;  %v509_v45 = vmul.f32 %v508_v34, %v977_v27 }
  0xad   :  { %s1252_s0 = sld [smem:[#allocation10 + $0x2]]  ;;  %v435_v17 = vstv %s1225_s11  ;;  %v371_v28 = vmax.f32 %v370_v10, 0.0  ;;  %v494_v47 = vadd.f32 %v493_v0, %v491_v32  ;;  %v510_v49 = vstv %s1186_s25 }
  0xae   :  { %s1255_s1 = sld [smem:[#allocation7 + $0x46]]  ;;  %v436_v4 = vadd.f32 %v435_v17, %v434_v12  ;;  %v404_v44 = vmax.f32 %v403_v26, 0.0  ;;  %v511_v53 = vmul.f32 %v510_v49, %v996_v42  ;;  %v519_v58 = vstv %s1219_s17 }
  0xaf   :  { %s1259_s19 = sld [smem:[#allocation10 + $0x3]]  ;;  %v514_v62 = vmul.f32 %v513_v56, %v998_v43  ;;  %v497_v63 = vadd.f32 %v496_v48, %v494_v47  ;;  %v517_v5 = vmul.f32 %v516_v57, %v1014_v54  ;;  %v522_v6 = vstv %s1229_s9 }
  0xb0   :  { %s1264_s3 = sld [smem:[#allocation7 + $0x47]]  ;;  %v468_v39 = vstv %s1240_s7  ;;  %v437_v46 = vmax.f32 %v436_v4, 0.0  ;;  %v512_v61 = vadd.f32 %v511_v53, %v509_v45  ;;  %v520_v9 = vmul.f32 %v519_v58, %v1030_v3 }
  0xb1   :  { %s1267_s20 = sld [smem:[#allocation10 + $0x4]]  ;;  %v308_v30 = vstv %s1244_s6  ;;  %v469_v55 = vadd.f32 %v468_v39, %v467_v36  ;;  %v525_v12 = vstv %s1235_s16  ;;  %v523_v17 = vmul.f32 %v522_v6, %v1045_v13 }
  0xb2   :  { %s1269_s21 = sld [smem:[#allocation7 + $0x48]]  ;;  %v340_v31 = vstv %s1248_s8  ;;  %v309_v40 = vmul.f32 %v308_v30, %v306_v24  ;;  %v515_v8 = vadd.f32 %v514_v62, %v512_v61  ;;  %v500_v19 = vadd.f32 %v499_v2, %v497_v63 }
  0xb3   :  { %s1274_s5 = sld [smem:[#allocation8 + $0x6]]  ;;  %v373_v35 = vstv %s1252_s0  ;;  %v341_v41 = vmul.f32 %v340_v31, %v338_v25  ;;  %v470_v11 = vmax.f32 %v469_v55, 0.0  ;;  %v526_v24 = vmul.f32 %v525_v12, %v1054_v18 }
  0xb4   :  { %s1278_s22 = sld [smem:[#allocation7 + $0x49]]  ;;  %v374_v50 = vmul.f32 %v373_v35, %v371_v28  ;;  %v518_v16 = vadd.f32 %v517_v5, %v515_v8  ;;  %v528_v20 = vstv %s1255_s1 }
  0xb5   :  { %s1282_s12 = sld [smem:[#allocation10 + $0x5]]  ;;  %v406_v51 = vstv %s1259_s19  ;;  %v342_v59 = vadd.f32 %v341_v41, %v309_v40  ;;  %v529_v28 = vmul.f32 %v528_v20, %v1078_v37 }
  0xb6   :  { %s1285_s27 = sld [smem:[#allocation7 + $0x4a]]  ;;  %v407_v10 = vmul.f32 %v406_v51, %v404_v44  ;;  %v521_v23 = vadd.f32 %v520_v9, %v518_v16  ;;  %v531_v29 = vstv %s1264_s3 }
  0xb7   :  { %s1289_s15 = sld [smem:[#allocation7 + $0x4b]]  ;;  %v439_v60 = vstv %s1267_s20  ;;  %v375_v14 = vadd.f32 %v374_v50, %v342_v59  ;;  %v532_v39 = vmul.f32 %v531_v29, %v1080_v38 }
  0xb8   :  { %s1294_s28 = sld [smem:[#allocation7 + $0x4c]]  ;;  %v440_v1 = vmul.f32 %v439_v60, %v437_v46  ;;  %v541_v21 = vstv %s1269_s21  ;;  %v524_v0 = vadd.f32 %v523_v17, %v521_v23 }
  0xb9   :  { %s1301_s4 = sld [smem:[#allocation7 + $0x4d]]  ;;  %v501_v7 = vstv %s1274_s5  ;;  %v542_v25 = vmul.f32 %v541_v21, %v977_v27  ;;  %v408_v34 = vadd.f32 %v407_v10, %v375_v14 }
  0xba   :  { %s1308_s18 = sld [smem:[#allocation7 + $0x4e]]  ;;  %v543_v22 = vstv %s1278_s22  ;;  %v502_v35 = vadd.f32 %v501_v7, %v500_v19  ;;  %v527_v36 = vadd.f32 %v526_v24, %v524_v0 }
  0xbb   :  { %s1311_s23 = sld [smem:[#allocation7 + $0x4f]]  ;;  %v472_v15 = vstv %s1282_s12  ;;  %v544_v26 = vmul.f32 %v543_v22, %v996_v42  ;;  %v441_v47 = vadd.f32 %v440_v1, %v408_v34 }
  0xbc   :  { %s1315_s13 = sld [smem:[#allocation8 + $0x7]]  ;;  %v546_v30 = vstv %s1285_s27  ;;  %v530_v45 = vadd.f32 %v529_v28, %v527_v36  ;;  %v473_v48 = vmul.f32 %v472_v15, %v470_v11  ;;  %v503_v50 = vmax.f32 %v502_v35, 0.0 }
  0xbd   :  { %s1320_s29 = sld [smem:[#allocation7 + $0x50]]  ;;  %v549_v31 = vstv %s1289_s15  ;;  %v545_v32 = vadd.f32 %v544_v26, %v542_v25  ;;  %v547_v33 = vmul.f32 %v546_v30, %v998_v43 }
  0xbe   :  { %s1325_s25 = sld [smem:[#allocation10 + $0x6]]  ;;  %v552_v4 = vstv %s1294_s28  ;;  %v550_v27 = vmul.f32 %v549_v31, %v1014_v54  ;;  %v533_v51 = vadd.f32 %v532_v39, %v530_v45  ;;  %v474_v59 = vadd.f32 %v473_v48, %v441_v47 }
  0xbf   :  { %v555_v42 = vstv %s1301_s4  ;;  %v548_v40 = vadd.f32 %v547_v33, %v545_v32  ;;  %v553_v41 = vmul.f32 %v552_v4, %v1030_v3  ;;  %s709_s14 = sld [smem:[#allocation10 + $0x7]] }
  0xc0   :  { %v558_v44 = vstv %s1308_s18  ;;  %v556_v43 = vmul.f32 %v555_v42, %v1045_v13  ;;  %s702_s26 = sld [smem:[#allocation8 + $0x8]] }
  0xc1   :  { %v551_v46 = vadd.f32 %v550_v27, %v548_v40  ;;  %v561_v54 = vstv %s1311_s23  ;;  %v559_v53 = vmul.f32 %v558_v44, %v1054_v18  ;;  %s710_s2 = sld [smem:[#allocation10 + $0x8]] }
  0xc2   :  { %v534_v49 = vstv %s1315_s13  ;;  %v562_v58 = vmul.f32 %v561_v54, %v1078_v37  ;;  %s1408_s10 = sld [smem:[#allocation32_spill]] }
  0xc3   :  { %v554_v52 = vadd.f32 %v553_v41, %v551_v46  ;;  %v564_v56 = vstv %s1320_s29  ;;  %v535_v3 = vadd.f32 %v534_v49, %v533_v51  ;;  %s1409_s9 = sld [smem:[#allocation33_spill]] }
  0xc4   :  { %v505_v55 = vstv %s1325_s25  ;;  %v565_v62 = vmul.f32 %v564_v56, %v1080_v38 }
  0xc5   :  { %v557_v57 = vadd.f32 %v556_v43, %v554_v52  ;;  %v506_v60 = vmul.f32 %v505_v55, %v503_v50  ;;  %v536_v13 = vmax.f32 %v535_v3, 0.0  ;;  %v538_v63 = vstv %s709_s14 }
  0xc6   :  { %v567_v5 = vstv %s702_s26 }
  0xc7   :  { %v560_v61 = vadd.f32 %v559_v53, %v557_v57  ;;  %v507_v6 = vadd.f32 %v506_v60, %v474_v59  ;;  %v539_v7 = vmul.f32 %v538_v63, %v536_v13  ;;  %v571_v9 = vstv %s710_s2 }
  0xc8   :  { %v575_v37 = vstv %s1408_s10 }
  0xc9   :  { %v563_v2 = vadd.f32 %v562_v58, %v560_v61  ;;  %v540_v10 = vadd.f32 %v539_v7, %v507_v6 }
  0xcb   :  { %v566_v8 = vadd.f32 %v565_v62, %v563_v2 }
  0xcd   :  { %v568_v18 = vadd.f32 %v567_v5, %v566_v8 }
  0xcf   :  { %v569_v1 = vmax.f32 %v568_v18, 0.0 }
  0xd1   :  { %v572_v11 = vmul.f32 %v571_v9, %v569_v1 }
  0xd3   :  { %v573_v12 = vadd.f32 %v572_v11, %v540_v10 }
  0xd5   :  { %v576_v14 = vadd.f32 %v575_v37, %v573_v12 }
  0xd7   :  { %v577_v15 = vmul.f32 0.5, %v576_v14 }
  0xd9   :  { %716 = vtanh.f32 %v577_v15 }
  0xdf   :  { %v717_v38 = vpop.eup %716 }
  0xe0   :  { %v579_v16 = vmul.f32 0.5, %v717_v38 }
  0xe2   :  { %v580_v17 = vadd.f32 0.5, %v579_v16 }
  0xe4   :  { %581 = vst [vmem:[%s1409_s9] sm:$0xff] %v580_v17 }
  0xe5   :  { %586 = vsyncpa [#allocation4], 1 }
  0xe6   :  { %587 = vsyncpa [#allocation6], 1 }
  0xe7   :  { %588 = vsyncpa [#allocation9], 1 }

</bundles_post_ra>
